<compile_context>
chip_gen: v7x
topology: tpu7x:2x2x1
jax: 0.10.0
libtpu: 0.0.40
codegen_flags: <defaults>
</compile_context>

<pallas_src>
import functools

import jax
import jax.numpy as jnp
import numpy as np
from jax.experimental import pallas as pl
from jax.experimental.pallas import tpu as pltpu

LEAKY_SLOPE = 0.1          # DomainBranch / ResidualBlock use nn.LeakyReLU(0.1)
BN_EPS = 1e-5
VMEM_LIMIT_BYTES = 48 * 1024 * 1024   # sized against v7x's 64 MiB physical VMEM


def _lrelu(v):
    return jnp.where(v > 0, v, LEAKY_SLOPE * v)


# ----------------------------------------------------------------------------
# Pallas kernels
# ----------------------------------------------------------------------------
def _stem_conv_s2_kernel(q00_ref, q01_ref, q10_ref, q11_ref, w_ref, b_ref,
                         o_ref, *, Ho, Wo):
    """3x3 stride-2 conv + folded BN + LeakyReLU for one batch element.

    Inputs are the even/odd row/col quadrants of the zero-padded image, so
    every tap of the strided conv is a plain unit-stride slice.  The 3 kw-taps
    are concatenated along channels -> 3 matmuls with K = 3*Cin.
    """
    cout = o_ref.shape[-1]
    quads = ((q00_ref[0].astype(jnp.bfloat16), q01_ref[0].astype(jnp.bfloat16)),
             (q10_ref[0].astype(jnp.bfloat16), q11_ref[0].astype(jnp.bfloat16)))
    acc = jnp.zeros((Ho * Wo, cout), jnp.float32)
    for kh in range(3):
        di = kh // 2
        taps = []
        for kw in range(3):
            qv = quads[kh % 2][kw % 2]
            dj = kw // 2
            taps.append(qv[di:di + Ho, dj:dj + Wo, :])
        patch = jnp.concatenate(taps, axis=-1)            # (Ho, Wo, 3*Cin) bf16
        patch = patch.reshape(Ho * Wo, patch.shape[-1])
        acc = acc + jnp.dot(patch, w_ref[kh],
                            preferred_element_type=jnp.float32)
    y = _lrelu(acc + b_ref[...])
    o_ref[0] = y.astype(o_ref.dtype)


def _resblock_kernel(x_ref, w1_ref, b1_ref, w2_ref, b2_ref, sw1_ref, sw2t_ref,
                     o_ref, *, H, W):
    """Fused residual block: conv1+BN1+LReLU -> conv2+BN2 -> SE -> +id -> LReLU.

    The feature map lives in "padded-width" layout: shape (H*(W+2), C) with
    the two horizontal zero-padding columns stored in place, so every conv tap
    is a contiguous row slab of the vertically-padded map.  Conv weights
    arrive as (3, 3*C, C) bf16 with the BN scale pre-folded.
    """
    G = W + 2
    HG = H * G
    C = x_ref.shape[-1]
    x = x_ref[0]                                           # (HG, C) f32

    col = jax.lax.broadcasted_iota(jnp.int32, (HG, 1), 0) % G
    valid = jnp.logical_and(col > 0, col < G - 1)          # real-pixel columns

    zpad = jnp.zeros((G + 1, C), jnp.bfloat16)

    def conv3x3(v_bf16, w_ref, bias):                      # -> (HG, C) f32
        vp = jnp.concatenate([zpad, v_bf16, zpad], axis=0)  # ((H+2)*G + 2, C)
        acc = jnp.zeros((HG, C), jnp.float32)
        for kh in range(3):
            base = kh * G
            patch = jnp.concatenate(
                [vp[base + kw: base + kw + HG, :] for kw in range(3)], axis=-1)
            acc = acc + jnp.dot(patch, w_ref[kh],
                                preferred_element_type=jnp.float32)
        return acc + bias

    h = conv3x3(x.astype(jnp.bfloat16), w1_ref, b1_ref[...])
    h = jnp.where(valid, _lrelu(h), 0.0)                   # conv1 + BN1 + LReLU
    h = conv3x3(h.astype(jnp.bfloat16), w2_ref, b2_ref[...])
    h = jnp.where(valid, h, 0.0)                           # conv2 + BN2

    # SE gate on the VPU (broadcast-mul + reductions); the (1,C)x(C,hid)
    # matmuls are too small to be worth MXU pushes.
    pooled = jnp.sum(h, axis=0, keepdims=True) * (1.0 / (H * W))      # (1, C)
    z = jnp.maximum(jnp.sum(pooled * sw1_ref[...], axis=-1, keepdims=True), 0.0)
    gate = jax.nn.sigmoid(jnp.sum(z * sw2t_ref[...], axis=0, keepdims=True))

    out = _lrelu(h * gate + x)                             # residual + LReLU
    o_ref[0] = out.astype(o_ref.dtype)


# ----------------------------------------------------------------------------
# Wrappers
# ----------------------------------------------------------------------------
def _fold_conv_weight(w_pt, scale):
    """(Cout, Cin, 3, 3) torch layout -> (3, 3*Cin, Cout) bf16, BN scale folded."""
    cout, cin = w_pt.shape[0], w_pt.shape[1]
    w = jnp.transpose(w_pt, (2, 3, 1, 0)) * scale          # (3, 3, Cin, Cout)
    return w.reshape(3, 3 * cin, cout).astype(jnp.bfloat16)


def conv3x3_s2_bn_lrelu(x, w_pt, scale, bias):
    """3x3 / stride-2 / pad-1 conv + folded BN + LeakyReLU.  x: (B, H, W, Cin)."""
    B, H, W, Cin = x.shape
    Cout = w_pt.shape[0]
    Ho, Wo = (H + 1) // 2, (W + 1) // 2
    # Quadrant decomposition of the zero-padded input:
    #   quads[2r+c][b, i, j, :] == xpad[b, 2i+r, 2j+c, :]
    xp = jnp.pad(x, ((0, 0), (1, 2 * Ho + 1 - H), (1, 2 * Wo + 1 - W), (0, 0)))
    q = xp.reshape(B, Ho + 1, 2, Wo + 1, 2, Cin)
    quads = [q[:, :, r, :, c, :] for r in range(2) for c in range(2)]
    wk = _fold_conv_weight(w_pt, scale)                    # (3, 3*Cin, Cout) bf16
    kernel = functools.partial(_stem_conv_s2_kernel, Ho=Ho, Wo=Wo)
    out = pl.pallas_call(
        kernel,
        out_shape=jax.ShapeDtypeStruct((B, Ho * Wo, Cout), jnp.float32),
        grid_spec=pltpu.PrefetchScalarGridSpec(
            num_scalar_prefetch=0,
            grid=(B,),
            in_specs=[pl.BlockSpec((1, Ho + 1, Wo + 1, Cin),
                                   lambda b: (b, 0, 0, 0)) for _ in range(4)] + [
                pl.BlockSpec((3, 3 * Cin, Cout), lambda b: (0, 0, 0)),
                pl.BlockSpec((1, Cout), lambda b: (0, 0)),
            ],
            out_specs=pl.BlockSpec((1, Ho * Wo, Cout), lambda b: (b, 0, 0)),
        ),
        compiler_params=pltpu.CompilerParams(
            dimension_semantics=("parallel",),
            vmem_limit_bytes=VMEM_LIMIT_BYTES),
    )(*quads, wk, bias.reshape(1, Cout))
    return out.reshape(B, Ho, Wo, Cout)


def residual_block(x_flat, w1, b1, w2, b2, se_w1, se_w2t, *, H, W):
    """Fused residual block.  x_flat: (B, H*(W+2), C) in padded-width layout."""
    B, HG, C = x_flat.shape
    hidden = se_w1.shape[0]
    kernel = functools.partial(_resblock_kernel, H=H, W=W)
    return pl.pallas_call(
        kernel,
        out_shape=jax.ShapeDtypeStruct((B, HG, C), jnp.float32),
        grid_spec=pltpu.PrefetchScalarGridSpec(
            num_scalar_prefetch=0,
            grid=(B,),
            in_specs=[
                pl.BlockSpec((1, HG, C), lambda b: (b, 0, 0)),
                pl.BlockSpec((3, 3 * C, C), lambda b: (0, 0, 0)),
                pl.BlockSpec((1, C), lambda b: (0, 0)),
                pl.BlockSpec((3, 3 * C, C), lambda b: (0, 0, 0)),
                pl.BlockSpec((1, C), lambda b: (0, 0)),
                pl.BlockSpec((hidden, C), lambda b: (0, 0)),
                pl.BlockSpec((hidden, C), lambda b: (0, 0)),
            ],
            out_specs=pl.BlockSpec((1, HG, C), lambda b: (b, 0, 0)),
        ),
        compiler_params=pltpu.CompilerParams(
            dimension_semantics=("parallel",),
            vmem_limit_bytes=VMEM_LIMIT_BYTES),
    )(x_flat, w1, b1, w2, b2, se_w1, se_w2t)


# ----------------------------------------------------------------------------
# Parameter init (deterministic, synthetic) and forward pass
# ----------------------------------------------------------------------------
def init_params(key, in_channels, base_channels, num_blocks, reduction=16):
    hidden = max(base_channels // reduction, 1)
    keys = iter(jax.random.split(key, 128))

    def conv_w(cout, cin):
        return jax.random.normal(next(keys), (cout, cin, 3, 3),
                                 jnp.float32) / np.sqrt(cin * 9.0)

    def bn_fold(conv_bias=None):
        c = base_channels
        gamma = 1.0 + 0.1 * jax.random.normal(next(keys), (c,), jnp.float32)
        beta = 0.1 * jax.random.normal(next(keys), (c,), jnp.float32)
        mean = 0.1 * jax.random.normal(next(keys), (c,), jnp.float32)
        var = jax.random.uniform(next(keys), (c,), jnp.float32, 0.5, 1.5)
        scale = gamma / jnp.sqrt(var + BN_EPS)
        bias = beta - mean * scale
        if conv_bias is not None:
            bias = bias + scale * conv_bias
        return scale, bias

    stem = []
    cin = in_channels
    for _ in range(2):
        w = conv_w(base_channels, cin)
        cb = 0.1 * jax.random.normal(next(keys), (base_channels,), jnp.float32)
        s, b = bn_fold(cb)
        stem.append(dict(w=w, s=s, b=b))
        cin = base_channels

    blocks = []
    for _ in range(num_blocks):
        w1 = conv_w(base_channels, base_channels)
        s1, b1 = bn_fold()
        w2 = conv_w(base_channels, base_channels)
        s2, b2 = bn_fold()
        se_w1 = jax.random.normal(next(keys), (hidden, base_channels),
                                  jnp.float32) / np.sqrt(base_channels)
        se_w2 = jax.random.normal(next(keys), (base_channels, hidden),
                                  jnp.float32) / np.sqrt(hidden)
        blocks.append(dict(w1=w1, s1=s1, b1=b1, w2=w2, s2=s2, b2=b2,
                           se_w1=se_w1, se_w2=se_w2))
    return dict(stem=stem, blocks=blocks)


def domain_branch_forward(x_nchw, params):
    x = jnp.transpose(x_nchw, (0, 2, 3, 1))                  # NCHW -> NHWC
    y = conv3x3_s2_bn_lrelu(x, params['stem'][0]['w'],
                            params['stem'][0]['s'], params['stem'][0]['b'])
    y = conv3x3_s2_bn_lrelu(y, params['stem'][1]['w'],
                            params['stem'][1]['s'], params['stem'][1]['b'])
    B, H, W, C = y.shape
    # Padded-width layout for the fused residual-block kernels: the horizontal
    # zero padding lives permanently in the feature map.
    yf = jnp.pad(y, ((0, 0), (0, 0), (1, 1), (0, 0))).reshape(B, H * (W + 2), C)
    for blk in params['blocks']:
        yf = residual_block(
            yf,
            _fold_conv_weight(blk['w1'], blk['s1']), blk['b1'].reshape(1, C),
            _fold_conv_weight(blk['w2'], blk['s2']), blk['b2'].reshape(1, C),
            blk['se_w1'], jnp.transpose(blk['se_w2']),
            H=H, W=W)
    y = yf.reshape(B, H, W + 2, C)[:, :, 1:W + 1, :]         # strip pad columns
    return jnp.transpose(y, (0, 3, 1, 2))                    # NHWC -> NCHW


def ref_forward(x_nchw, params):
    """Pure-JAX reference using the same folded-BN / bf16-operand math."""
    x = jnp.transpose(x_nchw, (0, 2, 3, 1))

    def conv(v, w_pt, scale, stride):
        w = (jnp.transpose(w_pt, (2, 3, 1, 0)) * scale).astype(jnp.bfloat16)
        return jax.lax.conv_general_dilated(
            v.astype(jnp.bfloat16), w, (stride, stride), ((1, 1), (1, 1)),
            dimension_numbers=('NHWC', 'HWIO', 'NHWC'),
            preferred_element_type=jnp.float32)

    y = _lrelu(conv(x, params['stem'][0]['w'], params['stem'][0]['s'], 2)
               + params['stem'][0]['b'])
    y = _lrelu(conv(y, params['stem'][1]['w'], params['stem'][1]['s'], 2)
               + params['stem'][1]['b'])
    for blk in params['blocks']:
        idn = y
        h = _lrelu(conv(y, blk['w1'], blk['s1'], 1) + blk['b1'])
        h = conv(h, blk['w2'], blk['s2'], 1) + blk['b2']
        pooled = h.mean(axis=(1, 2))
        z = jnp.maximum(jnp.einsum('bc,hc->bh', pooled, blk['se_w1'],
                                   precision=jax.lax.Precision.HIGHEST), 0.0)
        g = jax.nn.sigmoid(jnp.einsum('bh,ch->bc', z, blk['se_w2'],
                                      precision=jax.lax.Precision.HIGHEST))
        y = _lrelu(h * g[:, None, None, :] + idn)
    return jnp.transpose(y, (0, 3, 1, 2))


if __name__ == "__main__":
    key = jax.random.PRNGKey(0)
    kx, kp = jax.random.split(key)

    B, Cin, H, W = 2, 3, 16, 16
    base_channels, num_blocks = 32, 2   # small shapes; module defaults are 64 / 8

    x = jax.random.normal(kx, (B, Cin, H, W), jnp.float32)
    params = init_params(kp, Cin, base_channels, num_blocks)

    fwd = jax.jit(domain_branch_forward)
    out = jax.block_until_ready(fwd(x, params))

    ref = jax.block_until_ready(jax.jit(ref_forward)(x, params))
    # bf16 matmul operands (f32 accumulation) in both paths; remaining diffs
    # are accumulation-order only.
    np.testing.assert_allclose(np.asarray(out), np.asarray(ref),
                               rtol=1e-2, atol=1e-2)
    print("KERNEL_OK")
</pallas_src>

<mosaic_0001>
module attributes {stable_mosaic.version = 11 : i64} {
  func.func @_stem_conv_s2_kernel(%arg0: i32, %arg1: memref<1x9x9x3xf32, #tpu.memory_space<vmem>>, %arg2: memref<1x9x9x3xf32, #tpu.memory_space<vmem>>, %arg3: memref<1x9x9x3xf32, #tpu.memory_space<vmem>>, %arg4: memref<1x9x9x3xf32, #tpu.memory_space<vmem>>, %arg5: memref<3x9x32xbf16, #tpu.memory_space<vmem>>, %arg6: memref<1x32xf32, #tpu.memory_space<vmem>>, %arg7: memref<1x64x32xf32, #tpu.memory_space<vmem>>) attributes {dimension_semantics = [#tpu.dimension_semantics<parallel>], iteration_bounds = array<i64: 2>, scalar_prefetch = 0 : i64, scratch_operands = 0 : i64, tpu.core_type = #tpu.core_type<tc>, window_params = [{transform_indices = @transform_0, window_bounds = array<i64: 1, 9, 9, 3>}, {transform_indices = @transform_1, window_bounds = array<i64: 1, 9, 9, 3>}, {transform_indices = @transform_2, window_bounds = array<i64: 1, 9, 9, 3>}, {transform_indices = @transform_3, window_bounds = array<i64: 1, 9, 9, 3>}, {pipeline_mode = #tpu.pipeline_mode<synchronous>, transform_indices = @transform_4, window_bounds = array<i64: 3, 9, 32>}, {pipeline_mode = #tpu.pipeline_mode<synchronous>, transform_indices = @transform_5, window_bounds = array<i64: 1, 32>}, {transform_indices = @transform_6, window_bounds = array<i64: 1, 64, 32>}]} {
    %c0 = arith.constant 0 : index
    %c0_0 = arith.constant 0 : index
    %c0_1 = arith.constant 0 : index
    %c0_2 = arith.constant 0 : index
    %0 = vector.load %arg1[%c0, %c0_0, %c0_1, %c0_2] : memref<1x9x9x3xf32, #tpu.memory_space<vmem>>, vector<1x9x9x3xf32>
    %1 = vector.shape_cast %0 : vector<1x9x9x3xf32> to vector<9x9x3xf32>
    %2 = arith.truncf %1 : vector<9x9x3xf32> to vector<9x9x3xbf16>
    %c0_3 = arith.constant 0 : index
    %c0_4 = arith.constant 0 : index
    %c0_5 = arith.constant 0 : index
    %c0_6 = arith.constant 0 : index
    %3 = vector.load %arg2[%c0_3, %c0_4, %c0_5, %c0_6] : memref<1x9x9x3xf32, #tpu.memory_space<vmem>>, vector<1x9x9x3xf32>
    %4 = vector.shape_cast %3 : vector<1x9x9x3xf32> to vector<9x9x3xf32>
    %5 = arith.truncf %4 : vector<9x9x3xf32> to vector<9x9x3xbf16>
    %c0_7 = arith.constant 0 : index
    %c0_8 = arith.constant 0 : index
    %c0_9 = arith.constant 0 : index
    %c0_10 = arith.constant 0 : index
    %6 = vector.load %arg3[%c0_7, %c0_8, %c0_9, %c0_10] : memref<1x9x9x3xf32, #tpu.memory_space<vmem>>, vector<1x9x9x3xf32>
    %7 = vector.shape_cast %6 : vector<1x9x9x3xf32> to vector<9x9x3xf32>
    %8 = arith.truncf %7 : vector<9x9x3xf32> to vector<9x9x3xbf16>
    %c0_11 = arith.constant 0 : index
    %c0_12 = arith.constant 0 : index
    %c0_13 = arith.constant 0 : index
    %c0_14 = arith.constant 0 : index
    %9 = vector.load %arg4[%c0_11, %c0_12, %c0_13, %c0_14] : memref<1x9x9x3xf32, #tpu.memory_space<vmem>>, vector<1x9x9x3xf32>
    %10 = vector.shape_cast %9 : vector<1x9x9x3xf32> to vector<9x9x3xf32>
    %11 = arith.truncf %10 : vector<9x9x3xf32> to vector<9x9x3xbf16>
    %cst = arith.constant 0.000000e+00 : f32
    %12 = vector.broadcast %cst : f32 to vector<64x32xf32>
    %13 = vector.extract_strided_slice %2 {offsets = [0, 0, 0], sizes = [8, 8, 3], strides = [1, 1, 1]} : vector<9x9x3xbf16> to vector<8x8x3xbf16>
    %14 = vector.extract_strided_slice %5 {offsets = [0, 0, 0], sizes = [8, 8, 3], strides = [1, 1, 1]} : vector<9x9x3xbf16> to vector<8x8x3xbf16>
    %15 = vector.extract_strided_slice %2 {offsets = [0, 1, 0], sizes = [8, 8, 3], strides = [1, 1, 1]} : vector<9x9x3xbf16> to vector<8x8x3xbf16>
    %16 = tpu.concatenate %13, %14, %15 in 2 : vector<8x8x3xbf16>, vector<8x8x3xbf16>, vector<8x8x3xbf16> -> vector<8x8x9xbf16>
    %17 = vector.shape_cast %16 : vector<8x8x9xbf16> to vector<64x9xbf16>
    %c0_15 = arith.constant 0 : index
    %c0_16 = arith.constant 0 : index
    %c0_17 = arith.constant 0 : index
    %18 = vector.load %arg5[%c0_15, %c0_16, %c0_17] : memref<3x9x32xbf16, #tpu.memory_space<vmem>>, vector<1x9x32xbf16>
    %19 = vector.shape_cast %18 : vector<1x9x32xbf16> to vector<9x32xbf16>
    %cst_18 = arith.constant dense<0.000000e+00> : vector<64x32xf32>
    %20 = tpu.matmul %17, %19, %cst_18 {dimension_numbers = #tpu.dot_dimension_numbers<[1], [0], [0], [1], [0, 0, 1, 1], [], []>} : vector<64x9xbf16>, vector<9x32xbf16>, vector<64x32xf32> -> vector<64x32xf32>
    %21 = arith.addf %12, %20 : vector<64x32xf32>
    %22 = vector.extract_strided_slice %8 {offsets = [0, 0, 0], sizes = [8, 8, 3], strides = [1, 1, 1]} : vector<9x9x3xbf16> to vector<8x8x3xbf16>
    %23 = vector.extract_strided_slice %11 {offsets = [0, 0, 0], sizes = [8, 8, 3], strides = [1, 1, 1]} : vector<9x9x3xbf16> to vector<8x8x3xbf16>
    %24 = vector.extract_strided_slice %8 {offsets = [0, 1, 0], sizes = [8, 8, 3], strides = [1, 1, 1]} : vector<9x9x3xbf16> to vector<8x8x3xbf16>
    %25 = tpu.concatenate %22, %23, %24 in 2 : vector<8x8x3xbf16>, vector<8x8x3xbf16>, vector<8x8x3xbf16> -> vector<8x8x9xbf16>
    %26 = vector.shape_cast %25 : vector<8x8x9xbf16> to vector<64x9xbf16>
    %c1 = arith.constant 1 : index
    %c0_19 = arith.constant 0 : index
    %c0_20 = arith.constant 0 : index
    %27 = vector.load %arg5[%c1, %c0_19, %c0_20] : memref<3x9x32xbf16, #tpu.memory_space<vmem>>, vector<1x9x32xbf16>
    %28 = vector.shape_cast %27 : vector<1x9x32xbf16> to vector<9x32xbf16>
    %cst_21 = arith.constant dense<0.000000e+00> : vector<64x32xf32>
    %29 = tpu.matmul %26, %28, %cst_21 {dimension_numbers = #tpu.dot_dimension_numbers<[1], [0], [0], [1], [0, 0, 1, 1], [], []>} : vector<64x9xbf16>, vector<9x32xbf16>, vector<64x32xf32> -> vector<64x32xf32>
    %30 = arith.addf %21, %29 : vector<64x32xf32>
    %31 = vector.extract_strided_slice %2 {offsets = [1, 0, 0], sizes = [8, 8, 3], strides = [1, 1, 1]} : vector<9x9x3xbf16> to vector<8x8x3xbf16>
    %32 = vector.extract_strided_slice %5 {offsets = [1, 0, 0], sizes = [8, 8, 3], strides = [1, 1, 1]} : vector<9x9x3xbf16> to vector<8x8x3xbf16>
    %33 = vector.extract_strided_slice %2 {offsets = [1, 1, 0], sizes = [8, 8, 3], strides = [1, 1, 1]} : vector<9x9x3xbf16> to vector<8x8x3xbf16>
    %34 = tpu.concatenate %31, %32, %33 in 2 : vector<8x8x3xbf16>, vector<8x8x3xbf16>, vector<8x8x3xbf16> -> vector<8x8x9xbf16>
    %35 = vector.shape_cast %34 : vector<8x8x9xbf16> to vector<64x9xbf16>
    %c2 = arith.constant 2 : index
    %c0_22 = arith.constant 0 : index
    %c0_23 = arith.constant 0 : index
    %36 = vector.load %arg5[%c2, %c0_22, %c0_23] : memref<3x9x32xbf16, #tpu.memory_space<vmem>>, vector<1x9x32xbf16>
    %37 = vector.shape_cast %36 : vector<1x9x32xbf16> to vector<9x32xbf16>
    %cst_24 = arith.constant dense<0.000000e+00> : vector<64x32xf32>
    %38 = tpu.matmul %35, %37, %cst_24 {dimension_numbers = #tpu.dot_dimension_numbers<[1], [0], [0], [1], [0, 0, 1, 1], [], []>} : vector<64x9xbf16>, vector<9x32xbf16>, vector<64x32xf32> -> vector<64x32xf32>
    %39 = arith.addf %30, %38 : vector<64x32xf32>
    %c0_25 = arith.constant 0 : index
    %c0_26 = arith.constant 0 : index
    %40 = vector.load %arg6[%c0_25, %c0_26] : memref<1x32xf32, #tpu.memory_space<vmem>>, vector<1x32xf32>
    %41 = vector.broadcast %40 : vector<1x32xf32> to vector<64x32xf32>
    %42 = arith.addf %39, %41 : vector<64x32xf32>
    %cst_27 = arith.constant 0.000000e+00 : f32
    %43 = vector.broadcast %cst_27 : f32 to vector<64x32xf32>
    %44 = arith.cmpf ogt, %42, %43 : vector<64x32xf32>
    %cst_28 = arith.constant 1.000000e-01 : f32
    %45 = vector.broadcast %cst_28 : f32 to vector<64x32xf32>
    %46 = arith.mulf %45, %42 : vector<64x32xf32>
    %47 = arith.select %44, %42, %46 : vector<64x32xi1>, vector<64x32xf32>
    %c0_29 = arith.constant 0 : index
    %c0_30 = arith.constant 0 : index
    %c0_31 = arith.constant 0 : index
    %48 = vector.load %arg7[%c0_29, %c0_30, %c0_31] : memref<1x64x32xf32, #tpu.memory_space<vmem>>, vector<1x64x32xf32>
    %49 = vector.shape_cast %48 : vector<1x64x32xf32> to vector<64x32xf32>
    %50 = vector.shape_cast %47 : vector<64x32xf32> to vector<1x64x32xf32>
    tpu.vector_store %arg7[%c0_29, %c0_30, %c0_31], %50 {strides = array<i32>} : memref<1x64x32xf32, #tpu.memory_space<vmem>>, vector<1x64x32xf32>,
    return
  }
  func.func @transform_0(%arg0: i32) -> (i32, i32, i32, i32) {
    %c0_i32 = arith.constant 0 : i32
    %c0_i32_0 = arith.constant 0 : i32
    %c0_i32_1 = arith.constant 0 : i32
    %c0_i32_2 = arith.constant 0 : i32
    return %arg0, %c0_i32, %c0_i32_0, %c0_i32_1 : i32, i32, i32, i32
  }
  func.func @transform_1(%arg0: i32) -> (i32, i32, i32, i32) {
    %c0_i32 = arith.constant 0 : i32
    %c0_i32_0 = arith.constant 0 : i32
    %c0_i32_1 = arith.constant 0 : i32
    %c0_i32_2 = arith.constant 0 : i32
    return %arg0, %c0_i32, %c0_i32_0, %c0_i32_1 : i32, i32, i32, i32
  }
  func.func @transform_2(%arg0: i32) -> (i32, i32, i32, i32) {
    %c0_i32 = arith.constant 0 : i32
    %c0_i32_0 = arith.constant 0 : i32
    %c0_i32_1 = arith.constant 0 : i32
    %c0_i32_2 = arith.constant 0 : i32
    return %arg0, %c0_i32, %c0_i32_0, %c0_i32_1 : i32, i32, i32, i32
  }
  func.func @transform_3(%arg0: i32) -> (i32, i32, i32, i32) {
    %c0_i32 = arith.constant 0 : i32
    %c0_i32_0 = arith.constant 0 : i32
    %c0_i32_1 = arith.constant 0 : i32
    %c0_i32_2 = arith.constant 0 : i32
    return %arg0, %c0_i32, %c0_i32_0, %c0_i32_1 : i32, i32, i32, i32
  }
  func.func @transform_4(%arg0: i32) -> (i32, i32, i32) {
    %c0_i32 = arith.constant 0 : i32
    %c0_i32_0 = arith.constant 0 : i32
    %c0_i32_1 = arith.constant 0 : i32
    %c0_i32_2 = arith.constant 0 : i32
    return %c0_i32, %c0_i32_0, %c0_i32_1 : i32, i32, i32
  }
  func.func @transform_5(%arg0: i32) -> (i32, i32) {
    %c0_i32 = arith.constant 0 : i32
    %c0_i32_0 = arith.constant 0 : i32
    %c0_i32_1 = arith.constant 0 : i32
    return %c0_i32, %c0_i32_0 : i32, i32
  }
  func.func @transform_6(%arg0: i32) -> (i32, i32, i32) {
    %c0_i32 = arith.constant 0 : i32
    %c0_i32_0 = arith.constant 0 : i32
    %c0_i32_1 = arith.constant 0 : i32
    return %arg0, %c0_i32, %c0_i32_0 : i32, i32, i32
  }
}

module attributes {stable_mosaic.version = 11 : i64} {
  func.func @_stem_conv_s2_kernel(%arg0: i32, %arg1: memref<1x5x5x32xf32, #tpu.memory_space<vmem>>, %arg2: memref<1x5x5x32xf32, #tpu.memory_space<vmem>>, %arg3: memref<1x5x5x32xf32, #tpu.memory_space<vmem>>, %arg4: memref<1x5x5x32xf32, #tpu.memory_space<vmem>>, %arg5: memref<3x96x32xbf16, #tpu.memory_space<vmem>>, %arg6: memref<1x32xf32, #tpu.memory_space<vmem>>, %arg7: memref<1x16x32xf32, #tpu.memory_space<vmem>>) attributes {dimension_semantics = [#tpu.dimension_semantics<parallel>], iteration_bounds = array<i64: 2>, scalar_prefetch = 0 : i64, scratch_operands = 0 : i64, tpu.core_type = #tpu.core_type<tc>, window_params = [{transform_indices = @transform_0, window_bounds = array<i64: 1, 5, 5, 32>}, {transform_indices = @transform_1, window_bounds = array<i64: 1, 5, 5, 32>}, {transform_indices = @transform_2, window_bounds = array<i64: 1, 5, 5, 32>}, {transform_indices = @transform_3, window_bounds = array<i64: 1, 5, 5, 32>}, {pipeline_mode = #tpu.pipeline_mode<synchronous>, transform_indices = @transform_4, window_bounds = array<i64: 3, 96, 32>}, {pipeline_mode = #tpu.pipeline_mode<synchronous>, transform_indices = @transform_5, window_bounds = array<i64: 1, 32>}, {transform_indices = @transform_6, window_bounds = array<i64: 1, 16, 32>}]} {
    %c0 = arith.constant 0 : index
    %c0_0 = arith.constant 0 : index
    %c0_1 = arith.constant 0 : index
    %c0_2 = arith.constant 0 : index
    %0 = vector.load %arg1[%c0, %c0_0, %c0_1, %c0_2] : memref<1x5x5x32xf32, #tpu.memory_space<vmem>>, vector<1x5x5x32xf32>
    %1 = vector.shape_cast %0 : vector<1x5x5x32xf32> to vector<5x5x32xf32>
    %2 = arith.truncf %1 : vector<5x5x32xf32> to vector<5x5x32xbf16>
    %c0_3 = arith.constant 0 : index
    %c0_4 = arith.constant 0 : index
    %c0_5 = arith.constant 0 : index
    %c0_6 = arith.constant 0 : index
    %3 = vector.load %arg2[%c0_3, %c0_4, %c0_5, %c0_6] : memref<1x5x5x32xf32, #tpu.memory_space<vmem>>, vector<1x5x5x32xf32>
    %4 = vector.shape_cast %3 : vector<1x5x5x32xf32> to vector<5x5x32xf32>
    %5 = arith.truncf %4 : vector<5x5x32xf32> to vector<5x5x32xbf16>
    %c0_7 = arith.constant 0 : index
    %c0_8 = arith.constant 0 : index
    %c0_9 = arith.constant 0 : index
    %c0_10 = arith.constant 0 : index
    %6 = vector.load %arg3[%c0_7, %c0_8, %c0_9, %c0_10] : memref<1x5x5x32xf32, #tpu.memory_space<vmem>>, vector<1x5x5x32xf32>
    %7 = vector.shape_cast %6 : vector<1x5x5x32xf32> to vector<5x5x32xf32>
    %8 = arith.truncf %7 : vector<5x5x32xf32> to vector<5x5x32xbf16>
    %c0_11 = arith.constant 0 : index
    %c0_12 = arith.constant 0 : index
    %c0_13 = arith.constant 0 : index
    %c0_14 = arith.constant 0 : index
    %9 = vector.load %arg4[%c0_11, %c0_12, %c0_13, %c0_14] : memref<1x5x5x32xf32, #tpu.memory_space<vmem>>, vector<1x5x5x32xf32>
    %10 = vector.shape_cast %9 : vector<1x5x5x32xf32> to vector<5x5x32xf32>
    %11 = arith.truncf %10 : vector<5x5x32xf32> to vector<5x5x32xbf16>
    %cst = arith.constant 0.000000e+00 : f32
    %12 = vector.broadcast %cst : f32 to vector<16x32xf32>
    %13 = vector.extract_strided_slice %2 {offsets = [0, 0, 0], sizes = [4, 4, 32], strides = [1, 1, 1]} : vector<5x5x32xbf16> to vector<4x4x32xbf16>
    %14 = vector.extract_strided_slice %5 {offsets = [0, 0, 0], sizes = [4, 4, 32], strides = [1, 1, 1]} : vector<5x5x32xbf16> to vector<4x4x32xbf16>
    %15 = vector.extract_strided_slice %2 {offsets = [0, 1, 0], sizes = [4, 4, 32], strides = [1, 1, 1]} : vector<5x5x32xbf16> to vector<4x4x32xbf16>
    %16 = tpu.concatenate %13, %14, %15 in 2 : vector<4x4x32xbf16>, vector<4x4x32xbf16>, vector<4x4x32xbf16> -> vector<4x4x96xbf16>
    %17 = vector.shape_cast %16 : vector<4x4x96xbf16> to vector<16x96xbf16>
    %c0_15 = arith.constant 0 : index
    %c0_16 = arith.constant 0 : index
    %c0_17 = arith.constant 0 : index
    %18 = vector.load %arg5[%c0_15, %c0_16, %c0_17] : memref<3x96x32xbf16, #tpu.memory_space<vmem>>, vector<1x96x32xbf16>
    %19 = vector.shape_cast %18 : vector<1x96x32xbf16> to vector<96x32xbf16>
    %cst_18 = arith.constant dense<0.000000e+00> : vector<16x32xf32>
    %20 = tpu.matmul %17, %19, %cst_18 {dimension_numbers = #tpu.dot_dimension_numbers<[1], [0], [0], [1], [0, 0, 1, 1], [], []>} : vector<16x96xbf16>, vector<96x32xbf16>, vector<16x32xf32> -> vector<16x32xf32>
    %21 = arith.addf %12, %20 : vector<16x32xf32>
    %22 = vector.extract_strided_slice %8 {offsets = [0, 0, 0], sizes = [4, 4, 32], strides = [1, 1, 1]} : vector<5x5x32xbf16> to vector<4x4x32xbf16>
    %23 = vector.extract_strided_slice %11 {offsets = [0, 0, 0], sizes = [4, 4, 32], strides = [1, 1, 1]} : vector<5x5x32xbf16> to vector<4x4x32xbf16>
    %24 = vector.extract_strided_slice %8 {offsets = [0, 1, 0], sizes = [4, 4, 32], strides = [1, 1, 1]} : vector<5x5x32xbf16> to vector<4x4x32xbf16>
    %25 = tpu.concatenate %22, %23, %24 in 2 : vector<4x4x32xbf16>, vector<4x4x32xbf16>, vector<4x4x32xbf16> -> vector<4x4x96xbf16>
    %26 = vector.shape_cast %25 : vector<4x4x96xbf16> to vector<16x96xbf16>
    %c1 = arith.constant 1 : index
    %c0_19 = arith.constant 0 : index
    %c0_20 = arith.constant 0 : index
    %27 = vector.load %arg5[%c1, %c0_19, %c0_20] : memref<3x96x32xbf16, #tpu.memory_space<vmem>>, vector<1x96x32xbf16>
    %28 = vector.shape_cast %27 : vector<1x96x32xbf16> to vector<96x32xbf16>
    %cst_21 = arith.constant dense<0.000000e+00> : vector<16x32xf32>
    %29 = tpu.matmul %26, %28, %cst_21 {dimension_numbers = #tpu.dot_dimension_numbers<[1], [0], [0], [1], [0, 0, 1, 1], [], []>} : vector<16x96xbf16>, vector<96x32xbf16>, vector<16x32xf32> -> vector<16x32xf32>
    %30 = arith.addf %21, %29 : vector<16x32xf32>
    %31 = vector.extract_strided_slice %2 {offsets = [1, 0, 0], sizes = [4, 4, 32], strides = [1, 1, 1]} : vector<5x5x32xbf16> to vector<4x4x32xbf16>
    %32 = vector.extract_strided_slice %5 {offsets = [1, 0, 0], sizes = [4, 4, 32], strides = [1, 1, 1]} : vector<5x5x32xbf16> to vector<4x4x32xbf16>
    %33 = vector.extract_strided_slice %2 {offsets = [1, 1, 0], sizes = [4, 4, 32], strides = [1, 1, 1]} : vector<5x5x32xbf16> to vector<4x4x32xbf16>
    %34 = tpu.concatenate %31, %32, %33 in 2 : vector<4x4x32xbf16>, vector<4x4x32xbf16>, vector<4x4x32xbf16> -> vector<4x4x96xbf16>
    %35 = vector.shape_cast %34 : vector<4x4x96xbf16> to vector<16x96xbf16>
    %c2 = arith.constant 2 : index
    %c0_22 = arith.constant 0 : index
    %c0_23 = arith.constant 0 : index
    %36 = vector.load %arg5[%c2, %c0_22, %c0_23] : memref<3x96x32xbf16, #tpu.memory_space<vmem>>, vector<1x96x32xbf16>
    %37 = vector.shape_cast %36 : vector<1x96x32xbf16> to vector<96x32xbf16>
    %cst_24 = arith.constant dense<0.000000e+00> : vector<16x32xf32>
    %38 = tpu.matmul %35, %37, %cst_24 {dimension_numbers = #tpu.dot_dimension_numbers<[1], [0], [0], [1], [0, 0, 1, 1], [], []>} : vector<16x96xbf16>, vector<96x32xbf16>, vector<16x32xf32> -> vector<16x32xf32>
    %39 = arith.addf %30, %38 : vector<16x32xf32>
    %c0_25 = arith.constant 0 : index
    %c0_26 = arith.constant 0 : index
    %40 = vector.load %arg6[%c0_25, %c0_26] : memref<1x32xf32, #tpu.memory_space<vmem>>, vector<1x32xf32>
    %41 = vector.broadcast %40 : vector<1x32xf32> to vector<16x32xf32>
    %42 = arith.addf %39, %41 : vector<16x32xf32>
    %cst_27 = arith.constant 0.000000e+00 : f32
    %43 = vector.broadcast %cst_27 : f32 to vector<16x32xf32>
    %44 = arith.cmpf ogt, %42, %43 : vector<16x32xf32>
    %cst_28 = arith.constant 1.000000e-01 : f32
    %45 = vector.broadcast %cst_28 : f32 to vector<16x32xf32>
    %46 = arith.mulf %45, %42 : vector<16x32xf32>
    %47 = arith.select %44, %42, %46 : vector<16x32xi1>, vector<16x32xf32>
    %c0_29 = arith.constant 0 : index
    %c0_30 = arith.constant 0 : index
    %c0_31 = arith.constant 0 : index
    %48 = vector.load %arg7[%c0_29, %c0_30, %c0_31] : memref<1x16x32xf32, #tpu.memory_space<vmem>>, vector<1x16x32xf32>
    %49 = vector.shape_cast %48 : vector<1x16x32xf32> to vector<16x32xf32>
    %50 = vector.shape_cast %47 : vector<16x32xf32> to vector<1x16x32xf32>
    tpu.vector_store %arg7[%c0_29, %c0_30, %c0_31], %50 {strides = array<i32>} : memref<1x16x32xf32, #tpu.memory_space<vmem>>, vector<1x16x32xf32>,
    return
  }
  func.func @transform_0(%arg0: i32) -> (i32, i32, i32, i32) {
    %c0_i32 = arith.constant 0 : i32
    %c0_i32_0 = arith.constant 0 : i32
    %c0_i32_1 = arith.constant 0 : i32
    %c0_i32_2 = arith.constant 0 : i32
    return %arg0, %c0_i32, %c0_i32_0, %c0_i32_1 : i32, i32, i32, i32
  }
  func.func @transform_1(%arg0: i32) -> (i32, i32, i32, i32) {
    %c0_i32 = arith.constant 0 : i32
    %c0_i32_0 = arith.constant 0 : i32
    %c0_i32_1 = arith.constant 0 : i32
    %c0_i32_2 = arith.constant 0 : i32
    return %arg0, %c0_i32, %c0_i32_0, %c0_i32_1 : i32, i32, i32, i32
  }
  func.func @transform_2(%arg0: i32) -> (i32, i32, i32, i32) {
    %c0_i32 = arith.constant 0 : i32
    %c0_i32_0 = arith.constant 0 : i32
    %c0_i32_1 = arith.constant 0 : i32
    %c0_i32_2 = arith.constant 0 : i32
    return %arg0, %c0_i32, %c0_i32_0, %c0_i32_1 : i32, i32, i32, i32
  }
  func.func @transform_3(%arg0: i32) -> (i32, i32, i32, i32) {
    %c0_i32 = arith.constant 0 : i32
    %c0_i32_0 = arith.constant 0 : i32
    %c0_i32_1 = arith.constant 0 : i32
    %c0_i32_2 = arith.constant 0 : i32
    return %arg0, %c0_i32, %c0_i32_0, %c0_i32_1 : i32, i32, i32, i32
  }
  func.func @transform_4(%arg0: i32) -> (i32, i32, i32) {
    %c0_i32 = arith.constant 0 : i32
    %c0_i32_0 = arith.constant 0 : i32
    %c0_i32_1 = arith.constant 0 : i32
    %c0_i32_2 = arith.constant 0 : i32
    return %c0_i32, %c0_i32_0, %c0_i32_1 : i32, i32, i32
  }
  func.func @transform_5(%arg0: i32) -> (i32, i32) {
    %c0_i32 = arith.constant 0 : i32
    %c0_i32_0 = arith.constant 0 : i32
    %c0_i32_1 = arith.constant 0 : i32
    return %c0_i32, %c0_i32_0 : i32, i32
  }
  func.func @transform_6(%arg0: i32) -> (i32, i32, i32) {
    %c0_i32 = arith.constant 0 : i32
    %c0_i32_0 = arith.constant 0 : i32
    %c0_i32_1 = arith.constant 0 : i32
    return %arg0, %c0_i32, %c0_i32_0 : i32, i32, i32
  }
}

module attributes {stable_mosaic.version = 11 : i64} {
  func.func @_resblock_kernel(%arg0: i32, %arg1: memref<1x24x32xf32, #tpu.memory_space<vmem>>, %arg2: memref<3x96x32xbf16, #tpu.memory_space<vmem>>, %arg3: memref<1x32xf32, #tpu.memory_space<vmem>>, %arg4: memref<3x96x32xbf16, #tpu.memory_space<vmem>>, %arg5: memref<1x32xf32, #tpu.memory_space<vmem>>, %arg6: memref<2x32xf32, #tpu.memory_space<vmem>>, %arg7: memref<2x32xf32, #tpu.memory_space<vmem>>, %arg8: memref<1x24x32xf32, #tpu.memory_space<vmem>>) attributes {dimension_semantics = [#tpu.dimension_semantics<parallel>], iteration_bounds = array<i64: 2>, scalar_prefetch = 0 : i64, scratch_operands = 0 : i64, tpu.core_type = #tpu.core_type<tc>, window_params = [{transform_indices = @transform_0, window_bounds = array<i64: 1, 24, 32>}, {pipeline_mode = #tpu.pipeline_mode<synchronous>, transform_indices = @transform_1, window_bounds = array<i64: 3, 96, 32>}, {pipeline_mode = #tpu.pipeline_mode<synchronous>, transform_indices = @transform_2, window_bounds = array<i64: 1, 32>}, {pipeline_mode = #tpu.pipeline_mode<synchronous>, transform_indices = @transform_3, window_bounds = array<i64: 3, 96, 32>}, {pipeline_mode = #tpu.pipeline_mode<synchronous>, transform_indices = @transform_4, window_bounds = array<i64: 1, 32>}, {pipeline_mode = #tpu.pipeline_mode<synchronous>, transform_indices = @transform_5, window_bounds = array<i64: 2, 32>}, {pipeline_mode = #tpu.pipeline_mode<synchronous>, transform_indices = @transform_6, window_bounds = array<i64: 2, 32>}, {transform_indices = @transform_7, window_bounds = array<i64: 1, 24, 32>}]} {
    %c0 = arith.constant 0 : index
    %c0_0 = arith.constant 0 : index
    %c0_1 = arith.constant 0 : index
    %0 = vector.load %arg1[%c0, %c0_0, %c0_1] : memref<1x24x32xf32, #tpu.memory_space<vmem>>, vector<1x24x32xf32>
    %1 = vector.shape_cast %0 : vector<1x24x32xf32> to vector<24x32xf32>
    %2 = tpu.iota {dimensions = array<i32: 0>} : vector<24x1xi32>
    %c6_i32 = arith.constant 6 : i32
    %c0_i32 = arith.constant 0 : i32
    %3 = arith.cmpi eq, %c6_i32, %c0_i32 : i32
    %c1_i32 = arith.constant 1 : i32
    %4 = arith.select %3, %c1_i32, %c6_i32 : i32
    %5 = vector.broadcast %4 : i32 to vector<24x1xi32>
    %6 = arith.remsi %2, %5 : vector<24x1xi32>
    %c0_i32_2 = arith.constant 0 : i32
    %7 = vector.broadcast %c0_i32_2 : i32 to vector<24x1xi32>
    %8 = arith.cmpi ne, %6, %7 : vector<24x1xi32>
    %c0_i32_3 = arith.constant 0 : i32
    %9 = vector.broadcast %c0_i32_3 : i32 to vector<24x1xi32>
    %10 = arith.cmpi slt, %6, %9 : vector<24x1xi32>
    %c0_i32_4 = arith.constant 0 : i32
    %11 = arith.cmpi slt, %4, %c0_i32_4 : i32
    %12 = vector.broadcast %11 : i1 to vector<24x1xi1>
    %13 = vector.broadcast %12 : vector<24x1xi1> to vector<24x1xi1>
    %14 = arith.xori %10, %13 : vector<24x1xi1>
    %15 = arith.andi %14, %8 : vector<24x1xi1>
    %16 = vector.broadcast %4 : i32 to vector<24x1xi32>
    %17 = arith.addi %6, %16 : vector<24x1xi32>
    %18 = arith.select %15, %17, %6 : vector<24x1xi1>, vector<24x1xi32>
    %c0_i32_5 = arith.constant 0 : i32
    %19 = vector.broadcast %c0_i32_5 : i32 to vector<24x1xi32>
    %20 = arith.cmpi sgt, %18, %19 : vector<24x1xi32>
    %c5_i32 = arith.constant 5 : i32
    %21 = vector.broadcast %c5_i32 : i32 to vector<24x1xi32>
    %22 = arith.cmpi slt, %18, %21 : vector<24x1xi32>
    %23 = arith.andi %20, %22 : vector<24x1xi1>
    %cst = arith.constant 0.000000e+00 : bf16
    %24 = vector.broadcast %cst : bf16 to vector<7x32xbf16>
    %25 = arith.truncf %1 : vector<24x32xf32> to vector<24x32xbf16>
    %c0_6 = arith.constant 0 : index
    %c0_7 = arith.constant 0 : index
    %26 = vector.load %arg3[%c0_6, %c0_7] : memref<1x32xf32, #tpu.memory_space<vmem>>, vector<1x32xf32>
    %27 = tpu.concatenate %24, %25, %24 in 0 : vector<7x32xbf16>, vector<24x32xbf16>, vector<7x32xbf16> -> vector<38x32xbf16>
    %cst_8 = arith.constant 0.000000e+00 : f32
    %28 = vector.broadcast %cst_8 : f32 to vector<24x32xf32>
    %29 = vector.extract_strided_slice %27 {offsets = [0, 0], sizes = [24, 32], strides = [1, 1]} : vector<38x32xbf16> to vector<24x32xbf16>
    %30 = vector.extract_strided_slice %27 {offsets = [1, 0], sizes = [24, 32], strides = [1, 1]} : vector<38x32xbf16> to vector<24x32xbf16>
    %31 = vector.extract_strided_slice %27 {offsets = [2, 0], sizes = [24, 32], strides = [1, 1]} : vector<38x32xbf16> to vector<24x32xbf16>
    %32 = tpu.concatenate %29, %30, %31 in 1 : vector<24x32xbf16>, vector<24x32xbf16>, vector<24x32xbf16> -> vector<24x96xbf16>
    %c0_9 = arith.constant 0 : index
    %c0_10 = arith.constant 0 : index
    %c0_11 = arith.constant 0 : index
    %33 = vector.load %arg2[%c0_9, %c0_10, %c0_11] : memref<3x96x32xbf16, #tpu.memory_space<vmem>>, vector<1x96x32xbf16>
    %34 = vector.shape_cast %33 : vector<1x96x32xbf16> to vector<96x32xbf16>
    %cst_12 = arith.constant dense<0.000000e+00> : vector<24x32xf32>
    %35 = tpu.matmul %32, %34, %cst_12 {dimension_numbers = #tpu.dot_dimension_numbers<[1], [0], [0], [1], [0, 0, 1, 1], [], []>} : vector<24x96xbf16>, vector<96x32xbf16>, vector<24x32xf32> -> vector<24x32xf32>
    %36 = arith.addf %28, %35 : vector<24x32xf32>
    %37 = vector.extract_strided_slice %27 {offsets = [6, 0], sizes = [24, 32], strides = [1, 1]} : vector<38x32xbf16> to vector<24x32xbf16>
    %38 = vector.extract_strided_slice %27 {offsets = [7, 0], sizes = [24, 32], strides = [1, 1]} : vector<38x32xbf16> to vector<24x32xbf16>
    %39 = vector.extract_strided_slice %27 {offsets = [8, 0], sizes = [24, 32], strides = [1, 1]} : vector<38x32xbf16> to vector<24x32xbf16>
    %40 = tpu.concatenate %37, %38, %39 in 1 : vector<24x32xbf16>, vector<24x32xbf16>, vector<24x32xbf16> -> vector<24x96xbf16>
    %c1 = arith.constant 1 : index
    %c0_13 = arith.constant 0 : index
    %c0_14 = arith.constant 0 : index
    %41 = vector.load %arg2[%c1, %c0_13, %c0_14] : memref<3x96x32xbf16, #tpu.memory_space<vmem>>, vector<1x96x32xbf16>
    %42 = vector.shape_cast %41 : vector<1x96x32xbf16> to vector<96x32xbf16>
    %cst_15 = arith.constant dense<0.000000e+00> : vector<24x32xf32>
    %43 = tpu.matmul %40, %42, %cst_15 {dimension_numbers = #tpu.dot_dimension_numbers<[1], [0], [0], [1], [0, 0, 1, 1], [], []>} : vector<24x96xbf16>, vector<96x32xbf16>, vector<24x32xf32> -> vector<24x32xf32>
    %44 = arith.addf %36, %43 : vector<24x32xf32>
    %45 = vector.extract_strided_slice %27 {offsets = [12, 0], sizes = [24, 32], strides = [1, 1]} : vector<38x32xbf16> to vector<24x32xbf16>
    %46 = vector.extract_strided_slice %27 {offsets = [13, 0], sizes = [24, 32], strides = [1, 1]} : vector<38x32xbf16> to vector<24x32xbf16>
    %47 = vector.extract_strided_slice %27 {offsets = [14, 0], sizes = [24, 32], strides = [1, 1]} : vector<38x32xbf16> to vector<24x32xbf16>
    %48 = tpu.concatenate %45, %46, %47 in 1 : vector<24x32xbf16>, vector<24x32xbf16>, vector<24x32xbf16> -> vector<24x96xbf16>
    %c2 = arith.constant 2 : index
    %c0_16 = arith.constant 0 : index
    %c0_17 = arith.constant 0 : index
    %49 = vector.load %arg2[%c2, %c0_16, %c0_17] : memref<3x96x32xbf16, #tpu.memory_space<vmem>>, vector<1x96x32xbf16>
    %50 = vector.shape_cast %49 : vector<1x96x32xbf16> to vector<96x32xbf16>
    %cst_18 = arith.constant dense<0.000000e+00> : vector<24x32xf32>
    %51 = tpu.matmul %48, %50, %cst_18 {dimension_numbers = #tpu.dot_dimension_numbers<[1], [0], [0], [1], [0, 0, 1, 1], [], []>} : vector<24x96xbf16>, vector<96x32xbf16>, vector<24x32xf32> -> vector<24x32xf32>
    %52 = arith.addf %44, %51 : vector<24x32xf32>
    %53 = vector.broadcast %26 : vector<1x32xf32> to vector<24x32xf32>
    %54 = arith.addf %52, %53 : vector<24x32xf32>
    %cst_19 = arith.constant 0.000000e+00 : f32
    %55 = vector.broadcast %cst_19 : f32 to vector<24x32xf32>
    %56 = arith.cmpf ogt, %54, %55 : vector<24x32xf32>
    %cst_20 = arith.constant 1.000000e-01 : f32
    %57 = vector.broadcast %cst_20 : f32 to vector<24x32xf32>
    %58 = arith.mulf %57, %54 : vector<24x32xf32>
    %59 = arith.select %56, %54, %58 : vector<24x32xi1>, vector<24x32xf32>
    %cst_21 = arith.constant 0.000000e+00 : f32
    %60 = vector.shape_cast %23 : vector<24x1xi1> to vector<24x1xi1>
    %61 = vector.broadcast %60 : vector<24x1xi1> to vector<24x32xi1>
    %62 = vector.broadcast %cst_21 : f32 to vector<24x32xf32>
    %63 = arith.select %61, %59, %62 : vector<24x32xi1>, vector<24x32xf32>
    %64 = arith.truncf %63 : vector<24x32xf32> to vector<24x32xbf16>
    %c0_22 = arith.constant 0 : index
    %c0_23 = arith.constant 0 : index
    %65 = vector.load %arg5[%c0_22, %c0_23] : memref<1x32xf32, #tpu.memory_space<vmem>>, vector<1x32xf32>
    %66 = tpu.concatenate %24, %64, %24 in 0 : vector<7x32xbf16>, vector<24x32xbf16>, vector<7x32xbf16> -> vector<38x32xbf16>
    %cst_24 = arith.constant 0.000000e+00 : f32
    %67 = vector.broadcast %cst_24 : f32 to vector<24x32xf32>
    %68 = vector.extract_strided_slice %66 {offsets = [0, 0], sizes = [24, 32], strides = [1, 1]} : vector<38x32xbf16> to vector<24x32xbf16>
    %69 = vector.extract_strided_slice %66 {offsets = [1, 0], sizes = [24, 32], strides = [1, 1]} : vector<38x32xbf16> to vector<24x32xbf16>
    %70 = vector.extract_strided_slice %66 {offsets = [2, 0], sizes = [24, 32], strides = [1, 1]} : vector<38x32xbf16> to vector<24x32xbf16>
    %71 = tpu.concatenate %68, %69, %70 in 1 : vector<24x32xbf16>, vector<24x32xbf16>, vector<24x32xbf16> -> vector<24x96xbf16>
    %c0_25 = arith.constant 0 : index
    %c0_26 = arith.constant 0 : index
    %c0_27 = arith.constant 0 : index
    %72 = vector.load %arg4[%c0_25, %c0_26, %c0_27] : memref<3x96x32xbf16, #tpu.memory_space<vmem>>, vector<1x96x32xbf16>
    %73 = vector.shape_cast %72 : vector<1x96x32xbf16> to vector<96x32xbf16>
    %cst_28 = arith.constant dense<0.000000e+00> : vector<24x32xf32>
    %74 = tpu.matmul %71, %73, %cst_28 {dimension_numbers = #tpu.dot_dimension_numbers<[1], [0], [0], [1], [0, 0, 1, 1], [], []>} : vector<24x96xbf16>, vector<96x32xbf16>, vector<24x32xf32> -> vector<24x32xf32>
    %75 = arith.addf %67, %74 : vector<24x32xf32>
    %76 = vector.extract_strided_slice %66 {offsets = [6, 0], sizes = [24, 32], strides = [1, 1]} : vector<38x32xbf16> to vector<24x32xbf16>
    %77 = vector.extract_strided_slice %66 {offsets = [7, 0], sizes = [24, 32], strides = [1, 1]} : vector<38x32xbf16> to vector<24x32xbf16>
    %78 = vector.extract_strided_slice %66 {offsets = [8, 0], sizes = [24, 32], strides = [1, 1]} : vector<38x32xbf16> to vector<24x32xbf16>
    %79 = tpu.concatenate %76, %77, %78 in 1 : vector<24x32xbf16>, vector<24x32xbf16>, vector<24x32xbf16> -> vector<24x96xbf16>
    %c1_29 = arith.constant 1 : index
    %c0_30 = arith.constant 0 : index
    %c0_31 = arith.constant 0 : index
    %80 = vector.load %arg4[%c1_29, %c0_30, %c0_31] : memref<3x96x32xbf16, #tpu.memory_space<vmem>>, vector<1x96x32xbf16>
    %81 = vector.shape_cast %80 : vector<1x96x32xbf16> to vector<96x32xbf16>
    %cst_32 = arith.constant dense<0.000000e+00> : vector<24x32xf32>
    %82 = tpu.matmul %79, %81, %cst_32 {dimension_numbers = #tpu.dot_dimension_numbers<[1], [0], [0], [1], [0, 0, 1, 1], [], []>} : vector<24x96xbf16>, vector<96x32xbf16>, vector<24x32xf32> -> vector<24x32xf32>
    %83 = arith.addf %75, %82 : vector<24x32xf32>
    %84 = vector.extract_strided_slice %66 {offsets = [12, 0], sizes = [24, 32], strides = [1, 1]} : vector<38x32xbf16> to vector<24x32xbf16>
    %85 = vector.extract_strided_slice %66 {offsets = [13, 0], sizes = [24, 32], strides = [1, 1]} : vector<38x32xbf16> to vector<24x32xbf16>
    %86 = vector.extract_strided_slice %66 {offsets = [14, 0], sizes = [24, 32], strides = [1, 1]} : vector<38x32xbf16> to vector<24x32xbf16>
    %87 = tpu.concatenate %84, %85, %86 in 1 : vector<24x32xbf16>, vector<24x32xbf16>, vector<24x32xbf16> -> vector<24x96xbf16>
    %c2_33 = arith.constant 2 : index
    %c0_34 = arith.constant 0 : index
    %c0_35 = arith.constant 0 : index
    %88 = vector.load %arg4[%c2_33, %c0_34, %c0_35] : memref<3x96x32xbf16, #tpu.memory_space<vmem>>, vector<1x96x32xbf16>
    %89 = vector.shape_cast %88 : vector<1x96x32xbf16> to vector<96x32xbf16>
    %cst_36 = arith.constant dense<0.000000e+00> : vector<24x32xf32>
    %90 = tpu.matmul %87, %89, %cst_36 {dimension_numbers = #tpu.dot_dimension_numbers<[1], [0], [0], [1], [0, 0, 1, 1], [], []>} : vector<24x96xbf16>, vector<96x32xbf16>, vector<24x32xf32> -> vector<24x32xf32>
    %91 = arith.addf %83, %90 : vector<24x32xf32>
    %92 = vector.broadcast %65 : vector<1x32xf32> to vector<24x32xf32>
    %93 = arith.addf %91, %92 : vector<24x32xf32>
    %cst_37 = arith.constant 0.000000e+00 : f32
    %94 = vector.shape_cast %23 : vector<24x1xi1> to vector<24x1xi1>
    %95 = vector.broadcast %94 : vector<24x1xi1> to vector<24x32xi1>
    %96 = vector.broadcast %cst_37 : f32 to vector<24x32xf32>
    %97 = arith.select %95, %93, %96 : vector<24x32xi1>, vector<24x32xf32>
    %cst_38 = arith.constant dense<0.000000e+00> : vector<32xf32>
    %98 = vector.multi_reduction <add>, %97, %cst_38 [0] : vector<24x32xf32> to vector<32xf32>
    %99 = vector.shape_cast %98 : vector<32xf32> to vector<1x32xf32>
    %cst_39 = arith.constant 6.250000e-02 : f32
    %100 = vector.broadcast %cst_39 : f32 to vector<1x32xf32>
    %101 = arith.mulf %99, %100 : vector<1x32xf32>
    %c0_40 = arith.constant 0 : index
    %c0_41 = arith.constant 0 : index
    %102 = vector.load %arg6[%c0_40, %c0_41] : memref<2x32xf32, #tpu.memory_space<vmem>>, vector<2x32xf32>
    %103 = vector.broadcast %101 : vector<1x32xf32> to vector<2x32xf32>
    %104 = arith.mulf %103, %102 : vector<2x32xf32>
    %cst_42 = arith.constant dense<0.000000e+00> : vector<2xf32>
    %105 = vector.multi_reduction <add>, %104, %cst_42 [1] : vector<2x32xf32> to vector<2xf32>
    %106 = vector.shape_cast %105 : vector<2xf32> to vector<2x1xf32>
    %cst_43 = arith.constant 0.000000e+00 : f32
    %107 = vector.broadcast %cst_43 : f32 to vector<2x1xf32>
    %108 = arith.maximumf %106, %107 : vector<2x1xf32>
    %c0_44 = arith.constant 0 : index
    %c0_45 = arith.constant 0 : index
    %109 = vector.load %arg7[%c0_44, %c0_45] : memref<2x32xf32, #tpu.memory_space<vmem>>, vector<2x32xf32>
    %110 = vector.broadcast %108 : vector<2x1xf32> to vector<2x32xf32>
    %111 = arith.mulf %110, %109 : vector<2x32xf32>
    %cst_46 = arith.constant dense<0.000000e+00> : vector<32xf32>
    %112 = vector.multi_reduction <add>, %111, %cst_46 [0] : vector<2x32xf32> to vector<32xf32>
    %113 = vector.shape_cast %112 : vector<32xf32> to vector<1x32xf32>
    %114 = arith.negf %113 : vector<1x32xf32>
    %115 = math.exp %114 : vector<1x32xf32>
    %cst_47 = arith.constant 1.000000e+00 : f32
    %116 = vector.broadcast %cst_47 : f32 to vector<1x32xf32>
    %117 = arith.addf %116, %115 : vector<1x32xf32>
    %118 = arith.divf %116, %117 : vector<1x32xf32>
    %119 = vector.broadcast %118 : vector<1x32xf32> to vector<24x32xf32>
    %120 = arith.mulf %97, %119 : vector<24x32xf32>
    %121 = arith.addf %120, %1 : vector<24x32xf32>
    %cst_48 = arith.constant 0.000000e+00 : f32
    %122 = vector.broadcast %cst_48 : f32 to vector<24x32xf32>
    %123 = arith.cmpf ogt, %121, %122 : vector<24x32xf32>
    %cst_49 = arith.constant 1.000000e-01 : f32
    %124 = vector.broadcast %cst_49 : f32 to vector<24x32xf32>
    %125 = arith.mulf %124, %121 : vector<24x32xf32>
    %126 = arith.select %123, %121, %125 : vector<24x32xi1>, vector<24x32xf32>
    %c0_50 = arith.constant 0 : index
    %c0_51 = arith.constant 0 : index
    %c0_52 = arith.constant 0 : index
    %127 = vector.load %arg8[%c0_50, %c0_51, %c0_52] : memref<1x24x32xf32, #tpu.memory_space<vmem>>, vector<1x24x32xf32>
    %128 = vector.shape_cast %127 : vector<1x24x32xf32> to vector<24x32xf32>
    %129 = vector.shape_cast %126 : vector<24x32xf32> to vector<1x24x32xf32>
    tpu.vector_store %arg8[%c0_50, %c0_51, %c0_52], %129 {strides = array<i32>} : memref<1x24x32xf32, #tpu.memory_space<vmem>>, vector<1x24x32xf32>,
    return
  }
  func.func @transform_0(%arg0: i32) -> (i32, i32, i32) {
    %c0_i32 = arith.constant 0 : i32
    %c0_i32_0 = arith.constant 0 : i32
    %c0_i32_1 = arith.constant 0 : i32
    return %arg0, %c0_i32, %c0_i32_0 : i32, i32, i32
  }
  func.func @transform_1(%arg0: i32) -> (i32, i32, i32) {
    %c0_i32 = arith.constant 0 : i32
    %c0_i32_0 = arith.constant 0 : i32
    %c0_i32_1 = arith.constant 0 : i32
    %c0_i32_2 = arith.constant 0 : i32
    return %c0_i32, %c0_i32_0, %c0_i32_1 : i32, i32, i32
  }
  func.func @transform_2(%arg0: i32) -> (i32, i32) {
    %c0_i32 = arith.constant 0 : i32
    %c0_i32_0 = arith.constant 0 : i32
    %c0_i32_1 = arith.constant 0 : i32
    return %c0_i32, %c0_i32_0 : i32, i32
  }
  func.func @transform_3(%arg0: i32) -> (i32, i32, i32) {
    %c0_i32 = arith.constant 0 : i32
    %c0_i32_0 = arith.constant 0 : i32
    %c0_i32_1 = arith.constant 0 : i32
    %c0_i32_2 = arith.constant 0 : i32
    return %c0_i32, %c0_i32_0, %c0_i32_1 : i32, i32, i32
  }
  func.func @transform_4(%arg0: i32) -> (i32, i32) {
    %c0_i32 = arith.constant 0 : i32
    %c0_i32_0 = arith.constant 0 : i32
    %c0_i32_1 = arith.constant 0 : i32
    return %c0_i32, %c0_i32_0 : i32, i32
  }
  func.func @transform_5(%arg0: i32) -> (i32, i32) {
    %c0_i32 = arith.constant 0 : i32
    %c0_i32_0 = arith.constant 0 : i32
    %c0_i32_1 = arith.constant 0 : i32
    return %c0_i32, %c0_i32_0 : i32, i32
  }
  func.func @transform_6(%arg0: i32) -> (i32, i32) {
    %c0_i32 = arith.constant 0 : i32
    %c0_i32_0 = arith.constant 0 : i32
    %c0_i32_1 = arith.constant 0 : i32
    return %c0_i32, %c0_i32_0 : i32, i32
  }
  func.func @transform_7(%arg0: i32) -> (i32, i32, i32) {
    %c0_i32 = arith.constant 0 : i32
    %c0_i32_0 = arith.constant 0 : i32
    %c0_i32_1 = arith.constant 0 : i32
    return %arg0, %c0_i32, %c0_i32_0 : i32, i32, i32
  }
}

</mosaic_0001>

<bundles_post_ra>
// kernel: domain_branch_forward.4
= control target key start
LH: loop header
LB: loop body
LE: loop exit
PB: predicated region body
PF: predicated region fallthrough
CT: control target
= control target key end

     0   :  { %s1320_s21 = smov 0   ;;  %s1631_s0 = inlined_call_operand.vmem [shape: f32[2,9,9,3], index: 0, kind: input, shape index: {}]   ;;  %s1632_s1 = inlined_call_operand.vmem [shape: f32[2,9,9,3], index: 1, kind: input, shape index: {}]   ;;  %s1633_s2 = inlined_call_operand.vmem [shape: f32[2,9,9,3], index: 2, kind: input, shape index: {}]   ;;  %s1634_s3 = inlined_call_operand.vmem [shape: f32[2,9,9,3], index: 3, kind: input, shape index: {}]   ;;  %s1635_s4 = inlined_call_operand.vmem [shape: bf16[3,9,32], index: 4, kind: input, shape index: {}]   ;;  %s1636_s5 = inlined_call_operand.vmem [shape: f32[1,32], index: 5, kind: input, shape index: {}]   ;;  %s1637_s6 = inlined_call_operand.vmem [shape: f32[2,64,32], index: 6, kind: output, shape index: {}]  }
   0x1 LB: > { %s1150_s22 = sadd.s32 4294967295, %s1280_s21   ;;  %p1154_p0 = scmp.ge.s32.totalorder %s1280_s21, 1  ;;  %s1280_s21 = sphi %s1320_s21, %s16_s21  }
   0x2   : > { %p242_p1 = scmp.lt.s32.totalorder %s1280_s21, 3 }
   0x4   : > { %p243_p2 = pnand %p1154_p0, %p242_p1 }
   0x5   : > { %p287_p3 = scmp.lt.s32.totalorder (!%p243_p2), %s1150_s22, 1  ;;  %s1282_s9 = smov (!%p243_p2), 3   ;;  %vm716_vm0 = vcmask (!%p243_p2), 1043456   ;;  %vm717_vm1 = vcmask (!%p243_p2), 1044480   ;;  %vm511_vm2 = vcmask (!%p243_p2), 23552   ;;  %vm528_vm3 = vcmask (!%p243_p2), 48128  }
   0x6   : > { %246 = sbr.rel (%p243_p2) target bundleno = 426 (0x1aa), region = 44  ;;  %s1283_s13 = smov (!%p243_p2), 6   ;;  %vm703_vm4 = vcmask (!%p243_p2), 72704   ;;  %vm1050_vm6 = vcmask (!%p243_p2), 261120  }
   0xd   : > { %s1639_s22 = smov (!%p287_p3, %s1150_s22), 1 }
   0xe   : > { %s1259_s23 = smul.u32 144, %s1639_s22  ;;  %s1195_s24 = sshll.u32 %s1639_s22, 6 }
   0xf   : > { %s1610_s27 = scalar_lea.vmem %s1637_s6, %s1195_s24 }
  0x10   : > { %s1334_s26 = scalar_lea.vmem %s1634_s3, %s1259_s23  ;;  %s1341_s29 = scalar_lea.vmem %s1632_s1, %s1259_s23 }
  0x11   : > { %v391_v0 = vld [vmem:[%s1334_s26] sm:$0xff]  ;;  %v392_v1 = vld [vmem:[%s1334_s26 + $0x8] sm:$0x1]  ;;  %v393_v2 = vld [vmem:[%s1334_s26 + $0x10] sm:$0xff]  ;;  %s1350_s8 = scalar_lea.vmem %s1631_s0, %s1259_s23  ;;  %s1359_s12 = scalar_lea.vmem %s1633_s2, %s1259_s23 }
  0x12   : > { %v407_v3 = vpack.c.bf16 %v392_v1, %v391_v0  ;;  %v340_v4 = vld [vmem:[%s1341_s29] sm:$0xff]  ;;  %v341_v5 = vld [vmem:[%s1341_s29 + $0x8] sm:$0x1]  ;;  %v394_v6 = vld [vmem:[%s1334_s26 + $0x18] sm:$0x1] }
  0x13   : > { %v358_v7 = vpack.c.bf16 %v341_v5, %v340_v4  ;;  %v342_v8 = vld [vmem:[%s1341_s29 + $0x10] sm:$0xff]  ;;  %v343_v9 = vld [vmem:[%s1341_s29 + $0x18] sm:$0x1]  ;;  %v408_v10 = vpack.c.bf16 %v394_v6, %v393_v2  ;;  %v344_v14 = vld [vmem:[%s1341_s29 + $0x20] sm:$0xff] }
  0x14   : > { %555 = vrot.lane.b32.xlu1 %v407_v3, %s1282_s9  ;;  %v346_v11 = vld [vmem:[%s1341_s29 + $0x30] sm:$0xff]  ;;  %v359_v12 = vpack.c.bf16 %v343_v9, %v342_v8  ;;  %v347_v13 = vld [vmem:[%s1341_s29 + $0x38] sm:$0x1]  ;;  %v345_v15 = vld [vmem:[%s1341_s29 + $0x28] sm:$0x1] }
  0x15   : > { %423 = vrot.lane.b32.xlu0 %v358_v7, %s1282_s9  ;;  %v397_v16 = vld [vmem:[%s1334_s26 + $0x30] sm:$0xff]  ;;  %v398_v17 = vld [vmem:[%s1334_s26 + $0x38] sm:$0x1]  ;;  %v395_v18 = vld [vmem:[%s1334_s26 + $0x20] sm:$0xff]  ;;  %v361_v26 = vpack.c.bf16 %v347_v13, %v346_v11  ;;  %v360_v31 = vpack.c.bf16 %v345_v15, %v344_v14 }
  0x16   : > { %v396_v19 = vld [vmem:[%s1334_s26 + $0x28] sm:$0x1]  ;;  %v315_v20 = vld [vmem:[%s1350_s8 + $0x10] sm:$0xff]  ;;  %v316_v21 = vld [vmem:[%s1350_s8 + $0x18] sm:$0x1]  ;;  %v410_v40 = vpack.c.bf16 %v398_v17, %v397_v16 }
  0x17   : > { %v1371_v22 = vpack.c.bf16 %v316_v21, %v315_v20  ;;  %v313_v23 = vld [vmem:[%s1350_s8] sm:$0xff]  ;;  %v314_v24 = vld [vmem:[%s1350_s8 + $0x8] sm:$0x1]  ;;  %v369_v25 = vld [vmem:[%s1359_s12 + $0x10] sm:$0xff]  ;;  %v409_v41 = vpack.c.bf16 %v396_v19, %v395_v18 }
  0x18   : > { %557 = vrot.lane.b32.xlu1 %v408_v10, %s1282_s9  ;;  %v1377_v27 = vpack.c.bf16 %v314_v24, %v313_v23  ;;  %v370_v28 = vld [vmem:[%s1359_s12 + $0x18] sm:$0x1]  ;;  %v367_v29 = vld [vmem:[%s1359_s12] sm:$0xff]  ;;  %v368_v30 = vld [vmem:[%s1359_s12 + $0x8] sm:$0x1] }
  0x19   : > { %425 = vrot.lane.b32.xlu0 %v359_v12, %s1282_s9  ;;  %v449_v32 = vshll.u32 %v1371_v22, 16  ;;  %v1384_v33 = vpack.c.bf16 %v370_v28, %v369_v25  ;;  %v1386_v34 = vpack.c.bf16 %v368_v30, %v367_v29  ;;  %v319_v35 = vld [vmem:[%s1350_s8 + $0x30] sm:$0xff]  ;;  %v320_v36 = vld [vmem:[%s1350_s8 + $0x38] sm:$0x1]  ;;  %v317_v38 = vld [vmem:[%s1350_s8 + $0x20] sm:$0xff]  ;;  %v447_v42 = vshrl.u32 %v1371_v22, 16 }
  0x1a   : > { %v442_v37 = vshll.u32 %v1377_v27, 16  ;;  %v318_v39 = vld [vmem:[%s1350_s8 + $0x28] sm:$0x1]  ;;  %v1396_v45 = vpack.c.bf16 %v320_v36, %v319_v35  ;;  %v440_v46 = vshrl.u32 %v1377_v27, 16  ;;  %v373_v50 = vld [vmem:[%s1359_s12 + $0x30] sm:$0xff]  ;;  %v371_v52 = vld [vmem:[%s1359_s12 + $0x20] sm:$0xff] }
  0x1b   : > { %v451_v43 = vrot.slane %v449_v32, 1  ;;  %v581_v44 = vshll.u32 %v1384_v33, 16  ;;  %v574_v48 = vshll.u32 %v1386_v34, 16  ;;  %v1401_v49 = vpack.c.bf16 %v318_v39, %v317_v38  ;;  %v374_v51 = vld [vmem:[%s1359_s12 + $0x38] sm:$0x1]  ;;  %v377_v14 = vld [vmem:[%s1359_s12 + $0x50] sm:$0xff] }
  0x1c   : > { %429 = vrot.lane.b32.xlu1 %v361_v26, %s1282_s9  ;;  %v444_v47 = vrot.slane %v442_v37, 1  ;;  %v372_v53 = vld [vmem:[%s1359_s12 + $0x28] sm:$0x1]  ;;  %v579_v54 = vshrl.u32 %v1384_v33, 16  ;;  %v572_v55 = vshrl.u32 %v1386_v34, 16  ;;  %v463_v58 = vshll.u32 %v1396_v45, 16 }
  0x1d   : > { %427 = vrot.lane.b32.xlu0 %v360_v31, %s1282_s9  ;;  %v452_v56 = vor.u32 %v451_v43, %v447_v42  ;;  %v583_v57 = vrot.slane %v581_v44, 1  ;;  %v1411_v59 = vpack.c.bf16 %v374_v51, %v373_v50  ;;  %v576_v61 = vrot.slane %v574_v48, 1  ;;  %v378_v15 = vld [vmem:[%s1359_s12 + $0x58] sm:$0x1]  ;;  %v375_v16 = vld [vmem:[%s1359_s12 + $0x40] sm:$0xff]  ;;  %v401_v18 = vld [vmem:[%s1334_s26 + $0x50] sm:$0xff] }
  0x1e   : > { %v445_v60 = vor.u32 %v444_v47, %v440_v46  ;;  %v456_v62 = vshll.u32 %v1401_v49, 16  ;;  %v1415_v63 = vpack.c.bf16 %v372_v53, %v371_v52  ;;  %v461_v1 = vshrl.u32 %v1396_v45, 16  ;;  %v376_v17 = vld [vmem:[%s1359_s12 + $0x48] sm:$0x1]  ;;  %v402_v20 = vld [vmem:[%s1334_s26 + $0x58] sm:$0x1] }
  0x1f   : > { %v584_v0 = vor.u32 %v583_v57, %v579_v54  ;;  %v465_v2 = vrot.slane %v463_v58, 1  ;;  %v595_v3 = vshll.u32 %v1411_v59, 16  ;;  %v577_v4 = vor.u32 %v576_v61, %v572_v55  ;;  %v399_v21 = vld [vmem:[%s1334_s26 + $0x40] sm:$0xff]  ;;  %v400_v23 = vld [vmem:[%s1334_s26 + $0x48] sm:$0x1]  ;;  %v381_v28 = vld [vmem:[%s1359_s12 + $0x70] sm:$0xff] }
  0x20   : > { %561 = vrot.lane.b32.xlu1 %v410_v40, %s1282_s9  ;;  %v454_v5 = vshrl.u32 %v1401_v49, 16  ;;  %v458_v6 = vrot.slane %v456_v62, 1  ;;  %v588_v7 = vshll.u32 %v1415_v63, 16  ;;  %v593_v9 = vshrl.u32 %v1411_v59, 16  ;;  %v382_v29 = vld [vmem:[%s1359_s12 + $0x78] sm:$0x1] }
  0x21   : > { %559 = vrot.lane.b32.xlu0 %v409_v41, %s1282_s9  ;;  %v466_v8 = vor.u32 %v465_v2, %v461_v1  ;;  %v597_v10 = vrot.slane %v595_v3, 1  ;;  %v586_v12 = vshrl.u32 %v1415_v63, 16  ;;  %v1436_v24 = vpack.c.bf16 %v378_v15, %v377_v14  ;;  %v379_v30 = vld [vmem:[%s1359_s12 + $0x60] sm:$0xff]  ;;  %v380_v31 = vld [vmem:[%s1359_s12 + $0x68] sm:$0x1]  ;;  %v405_v37 = vld [vmem:[%s1334_s26 + $0x70] sm:$0xff] }
  0x22   : > { %v459_v11 = vor.u32 %v458_v6, %v454_v5  ;;  %v590_v13 = vrot.slane %v588_v7, 1  ;;  %v1439_v26 = vpack.c.bf16 %v376_v17, %v375_v16  ;;  %v1271_v32 = vld [vmem:[%s1635_s4] sm:$0x1f]   ;;  %v1272_v35 = vld [vmem:[%s1635_s4 + $0x8] sm:$0x1f]   ;;  %v412_v36 = vpack.c.bf16 %v402_v20, %v401_v18 }
  0x23   : > { %v598_v19 = vor.u32 %v597_v10, %v593_v9  ;;  %v406_v38 = vld [vmem:[%s1334_s26 + $0x78] sm:$0x1]  ;;  %v609_v39 = vshll.u32 %v1436_v24, 16  ;;  %v1455_v40 = vpack.c.bf16 %v382_v29, %v381_v28  ;;  %v1284_v41 = vmov 65535   ;;  %v321_v47 = vld [vmem:[%s1350_s8 + $0x40] sm:$0xff]  ;;  %v350_v28 = vld [vmem:[%s1341_s29 + $0x50] sm:$0xff] }
  0x24   : > { %497 = vrot.lane.b32.xlu1 %v452_v56, %s1283_s13  ;;  %v591_v25 = vor.u32 %v590_v13, %v586_v12  ;;  %v718_v42 = vsel %vm716_vm0, 4294967295, %v1284_v41  ;;  %v411_v43 = vpack.c.bf16 %v400_v23, %v399_v21  ;;  %v602_v44 = vshll.u32 %v1439_v26, 16  ;;  %v322_v48 = vld [vmem:[%s1350_s8 + $0x48] sm:$0x1]  ;;  %v403_v51 = vld [vmem:[%s1334_s26 + $0x60] sm:$0xff] }
  0x25   : > { %495 = vrot.lane.b32.xlu0 %v445_v60, %s1283_s13  ;;  %v1459_v46 = vpack.c.bf16 %v380_v31, %v379_v30  ;;  %v719_v50 = vsel %vm717_vm1, %v718_v42, 0  ;;  %v404_v52 = vld [vmem:[%s1334_s26 + $0x68] sm:$0x1]  ;;  %v414_v55 = vpack.c.bf16 %v406_v38, %v405_v37  ;;  %v607_v56 = vshrl.u32 %v1436_v24, 16  ;;  %v1273_v61 = vld [vmem:[%s1635_s4 + $0x10] sm:$0x1f]  }
  0x26   : > { %v1465_v53 = vand.u32 %v1271_v32, %v719_v50  ;;  %v721_v54 = vand.u32 %v1272_v35, %v719_v50  ;;  %v611_v57 = vrot.slane %v609_v39, 1  ;;  %v623_v58 = vshll.u32 %v1455_v40, 16  ;;  %v324_v12 = vld [vmem:[%s1350_s8 + $0x58] sm:$0x1]  ;;  %v348_v18 = vld [vmem:[%s1341_s29 + $0x40] sm:$0xff]  ;;  %v327_v38 = vld [vmem:[%s1350_s8 + $0x70] sm:$0xff] }
  0x27   : > { %v1470_v60 = vpack.c.bf16 %v322_v48, %v321_v47  ;;  %v413_v62 = vpack.c.bf16 %v404_v52, %v403_v51  ;;  %v604_v1 = vrot.slane %v602_v44, 1  ;;  %v616_v2 = vshll.u32 %v1459_v46, 16  ;;  %v325_v20 = vld [vmem:[%s1350_s8 + $0x60] sm:$0xff]  ;;  %v326_v21 = vld [vmem:[%s1350_s8 + $0x68] sm:$0x1]  ;;  %v354_v51 = vld [vmem:[%s1341_s29 + $0x70] sm:$0xff] }
  0x28   : > { %629 = vrot.lane.b32.xlu1 %v584_v0, %s1283_s13  ;;  %1221 = vmatprep.subr.bf16.mxu0 %v1465_v53  ;;  %v600_v0 = vshrl.u32 %v1439_v26, 16  ;;  %v1480_v3 = vand.u32 %v1273_v61, %v719_v50  ;;  %v621_v5 = vshrl.u32 %v1455_v40, 16  ;;  %v625_v6 = vrot.slane %v623_v58, 1  ;;  %v353_v31 = vld [vmem:[%s1341_s29 + $0x68] sm:$0x1]  ;;  %v329_v35 = vld [vmem:[%s1350_s8 + $0x80] sm:$0xff] }
  0x29   : > { %627 = vrot.lane.b32.xlu0 %v577_v4, %s1283_s13  ;;  %1222 = vmatpush3.bf16.msra.mxu0 %v1465_v53  ;;  %v612_v4 = vor.u32 %v611_v57, %v607_v56  ;;  %v470_v7 = vshll.u32 %v1470_v60, 16  ;;  %v614_v9 = vshrl.u32 %v1459_v46, 16  ;;  %v618_v10 = vrot.slane %v616_v2, 1  ;;  %v351_v37 = vld [vmem:[%s1341_s29 + $0x58] sm:$0x1]  ;;  %v356_v57 = vld [vmem:[%s1341_s29 + $0x80] sm:$0xff] }
  0x2a   : > { %1211 = vmatprep.subr.bf16.mxu1 %v721_v54  ;;  %1231 = vmatprep.subr.bf16.mxu0 %v1480_v3  ;;  %v626_v13 = vor.u32 %v625_v6, %v621_v5  ;;  %v468_v14 = vshrl.u32 %v1470_v60, 16  ;;  %v1506_v32 = vpack.c.bf16 %v326_v21, %v325_v20  ;;  %v328_v39 = vld [vmem:[%s1350_s8 + $0x78] sm:$0x1]  ;;  %v363_v47 = vpack.c.bf16 %v351_v37, %v350_v28  ;;  %v357_v58 = vld [vmem:[%s1341_s29 + $0x88] sm:$0x1] }
  0x2b   : > { %1212 = vmatpush3.bf16.msra.mxu1 %v721_v54  ;;  %v472_v15 = vrot.slane %v470_v7, 1  ;;  %v619_v17 = vor.u32 %v618_v10, %v614_v9  ;;  %v1519_v50 = vpack.c.bf16 %v328_v39, %v327_v38  ;;  %v355_v52 = vld [vmem:[%s1341_s29 + $0x78] sm:$0x1] }
  0x2c   : > { %501 = vrot.lane.b32.xlu1 %v466_v8, %s1283_s13  ;;  %1241 = vmatprep.subr.bf16.mxu1 %v1465_v53  ;;  %v605_v8 = vor.u32 %v604_v1, %v600_v0  ;;  %v484_v48 = vshll.u32 %v1506_v32, 16  ;;  %v365_v56 = vpack.c.bf16 %v355_v52, %v354_v51  ;;  %v482_v61 = vshrl.u32 %v1506_v32, 16 }
  0x2d   : > { %499 = vrot.lane.b32.xlu0 %v459_v11, %s1283_s13  ;;  %v323_v11 = vld [vmem:[%s1350_s8 + $0x50] sm:$0xff]  ;;  %v473_v23 = vor.u32 %v472_v15, %v468_v14  ;;  %v491_v0 = vshll.u32 %v1519_v50, 16  ;;  %v366_v1 = vpack.c.bf16 %v357_v58, %v356_v57  ;;  %v489_v6 = vshrl.u32 %v1519_v50, 16 }
  0x2e   : > { %v1493_v16 = vpack.c.bf16 %v324_v12, %v323_v11 }
  0x2f   : > { %v493_v7 = vrot.slane %v491_v0, 1 }
  0x30   : > { %633 = vrot.lane.b32.xlu1 %v598_v19, %s1283_s13  ;;  %v349_v19 = vld [vmem:[%s1341_s29 + $0x48] sm:$0x1]  ;;  %v477_v29 = vshll.u32 %v1493_v16, 16  ;;  %v475_v42 = vshrl.u32 %v1493_v16, 16 }
  0x31   : > { %631 = vrot.lane.b32.xlu0 %v591_v25, %s1283_s13  ;;  %v352_v25 = vld [vmem:[%s1341_s29 + $0x60] sm:$0xff]  ;;  %v362_v30 = vpack.c.bf16 %v349_v19, %v348_v18  ;;  %v494_v9 = vor.u32 %v493_v7, %v489_v6 }
  0x32   : > { %v364_v41 = vpack.c.bf16 %v353_v31, %v352_v25 }
  0x34   : > { %565 = vrot.lane.b32.xlu1 %v412_v36, %s1282_s9  ;;  %v330_v36 = vld [vmem:[%s1350_s8 + $0x88] sm:$0x1] }
  0x35   : > { %563 = vrot.lane.b32.xlu0 %v411_v43, %s1282_s9  ;;  %v479_v43 = vrot.slane %v477_v29, 1  ;;  %v1515_v44 = vpack.c.bf16 %v330_v36, %v329_v35 }
  0x37   : > { %v480_v54 = vor.u32 %v479_v43, %v475_v42  ;;  %v897_v2 = vshrl.u32 %v1515_v44, 16 }
  0x38   : > { %569 = vrot.lane.b32.xlu1 %v414_v55, %s1282_s9  ;;  %v899_v55 = vshll.u32 %v1515_v44, 16 }
  0x39   : > { %567 = vrot.lane.b32.xlu0 %v413_v62, %s1282_s9  ;;  %v486_v62 = vrot.slane %v484_v48, 1 }
  0x3b   : > { %v487_v5 = vor.u32 %v486_v62, %v482_v61 }
  0x3c   : > { %637 = vrot.lane.b32.xlu1 %v612_v4, %s1283_s13  ;;  %v901_v4 = vrot.slane %v899_v55, 1 }
  0x3d   : > { %635 = vrot.lane.b32.xlu0 %v605_v8, %s1283_s13 }
  0x3e   : > { %v902_v8 = vor.u32 %v901_v4, %v897_v2 }
  0x40   : > { %641 = vrot.lane.b32.xlu1 %v626_v13, %s1283_s13 }
  0x41   : > { %639 = vrot.lane.b32.xlu0 %v619_v17, %s1283_s13 }
  0x44   : > { %503 = vrot.lane.b32.xlu1 %v473_v23, %s1283_s13 }
  0x45   : > { %431 = vrot.lane.b32.xlu0 %v362_v30, %s1282_s9 }
  0x48   : > { %435 = vrot.lane.b32.xlu1 %v364_v41, %s1282_s9 }
  0x49   : > { %433 = vrot.lane.b32.xlu0 %v363_v47, %s1282_s9 }
  0x4c   : > { %505 = vrot.lane.b32.xlu1 %v480_v54, %s1283_s13 }
  0x4d   : > { %437 = vrot.lane.b32.xlu0 %v365_v56, %s1282_s9 }
  0x50   : > { %894 = vrot.lane.b32.xlu1 %v366_v1, %s1282_s9 }
  0x51   : > { %507 = vrot.lane.b32.xlu0 %v487_v5, %s1283_s13 }
  0x54   : > { %903 = vrot.lane.b32.xlu1 %v902_v8, %s1283_s13 }
  0x55   : > { %509 = vrot.lane.b32.xlu0 %v494_v9, %s1283_s13 }
  0x86   : > { %v556_v10 = vpop.permute.xlu1 %555 }
  0x87   : > { %v424_v11 = vpop.permute.xlu0 %423  ;;  %v644_v35 = vsel %vm511_vm2, %v1386_v34, %v556_v10 }
  0x88   : > { %v513_v21 = vsel %vm511_vm2, %v1377_v27, %v424_v11 }
  0x8a   : > { %v558_v12 = vpop.permute.xlu1 %557 }
  0x8b   : > { %v426_v13 = vpop.permute.xlu0 %425  ;;  %v646_v30 = vsel %vm511_vm2, %v1384_v33, %v558_v12 }
  0x8c   : > { %v515_v19 = vsel %vm511_vm2, %v1371_v22, %v426_v13 }
  0x8e   : > { %v430_v14 = vpop.permute.xlu1 %429 }
  0x8f   : > { %v428_v15 = vpop.permute.xlu0 %427  ;;  %v519_v38 = vsel %vm511_vm2, %v1396_v45, %v430_v14 }
  0x90   : > { %v517_v41 = vsel %vm511_vm2, %v1401_v49, %v428_v15 }
  0x92   : > { %v562_v17 = vpop.permute.xlu1 %561 }
  0x93   : > { %v560_v18 = vpop.permute.xlu0 %559  ;;  %v650_v48 = vsel %vm511_vm2, %v1411_v59, %v562_v17 }
  0x94   : > { %v648_v45 = vsel %vm511_vm2, %v1415_v63, %v560_v18 }
  0x96   : > { %v498_v20 = vpop.permute.xlu1 %497 }
  0x97   : > { %v532_v23 = vsel %vm528_vm3, %v515_v19, %v498_v20  ;;  %v496_v25 = vpop.permute.xlu0 %495 }
  0x98   : > { %v530_v28 = vsel %vm528_vm3, %v513_v21, %v496_v25 }
  0x99   : > { %v1172_v29 = vcombine.low %v530_v28, %v532_v23 }
  0x9a   : > { %v630_v31 = vpop.permute.xlu1 %629 }
  0x9b   : > { %v662_v22 = vsel %vm528_vm3, %v646_v30, %v630_v31  ;;  %1223 = vmatprep.mubr.msk.bf16.mxu0 %vm703_vm4, %v1172_v29  ;;  %v628_v36 = vpop.permute.xlu0 %627 }
  0x9c   : > { %v660_v27 = vsel %vm528_vm3, %v644_v35, %v628_v36 }
  0x9d   : > { %v1163_v37 = vcombine.low %v660_v27, %v662_v22 }
  0x9e   : > { %v502_v39 = vpop.permute.xlu1 %501 }
  0x9f   : > { %v536_v33 = vsel %vm528_vm3, %v519_v38, %v502_v39  ;;  %1213 = vmatprep.mubr.msk.bf16.mxu1 %vm703_vm4, %v1163_v37  ;;  %v500_v34 = vpop.permute.xlu0 %499 }
  0xa0   : > { %v534_v42 = vsel %vm528_vm3, %v517_v41, %v500_v34 }
  0xa1   : > { %v1173_v43 = vcombine.low %v534_v42, %v536_v33  ;;  %v1183_v47 = vcombine.low %v532_v23, %v534_v42 }
  0xa2   : > { %v634_v51 = vpop.permute.xlu1 %633 }
  0xa3   : > { %v666_v52 = vsel %vm528_vm3, %v650_v48, %v634_v51  ;;  %1224 = vmatmul.mubr.msk.bf16.vlgmr.msra.gmra.mrb[0].mxu0 %vm703_vm4, %v1173_v43  ;;  %v632_v49 = vpop.permute.xlu0 %631 }
  0xa4   : > { %v664_v54 = vsel %vm528_vm3, %v648_v45, %v632_v49  ;;  %1233 = vmatprep.mubr.msk.bf16.mxu0 %vm703_vm4, %v1183_v47  ;;  %1232 = vmatpush3.bf16.msra.mxu0 %v1480_v3 }
  0xa5   : > { %v1164_v55 = vcombine.low %v664_v54, %v666_v52 }
  0xa6   : > { %v566_v56 = vpop.permute.xlu1 %565 }
  0xa7   : > { %1214 = vmatmul.mubr.msk.bf16.vlgmr.msra.gmra.mrb[0].mxu1 %vm703_vm4, %v1164_v55  ;;  %v564_v59 = vpop.permute.xlu0 %563  ;;  %v654_v58 = vsel %vm511_vm2, %v1436_v24, %v566_v56 }
  0xa8   : > { %1242 = vmatpush3.bf16.msra.mxu1 %v1465_v53  ;;  %v652_v62 = vsel %vm511_vm2, %v1439_v26, %v564_v59 }
  0xaa   : > { %v570_v57 = vpop.permute.xlu1 %569 }
  0xab   : > { %v568_v63 = vpop.permute.xlu0 %567  ;;  %v658_v4 = vsel %vm511_vm2, %v1455_v40, %v570_v57 }
  0xac   : > { %v656_v53 = vsel %vm511_vm2, %v1459_v46, %v568_v63 }
  0xae   : > { %v638_v61 = vpop.permute.xlu1 %637 }
  0xaf   : > { %v670_v0 = vsel %vm528_vm3, %v654_v58, %v638_v61  ;;  %v636_v1 = vpop.permute.xlu0 %635 }
  0xb0   : > { %v668_v3 = vsel %vm528_vm3, %v652_v62, %v636_v1 }
  0xb1   : > { %v1165_v2 = vcombine.low %v668_v3, %v670_v0 }
  0xb2   : > { %v642_v5 = vpop.permute.xlu1 %641 }
  0xb3   : > { %v674_v6 = vsel %vm528_vm3, %v658_v4, %v642_v5  ;;  %1217 = vmatprep.mubr.msk.bf16.mxu1 %vm703_vm4, %v1165_v2  ;;  %v640_v24 = vpop.permute.xlu0 %639 }
  0xb4   : > { %v672_v26 = vsel %vm528_vm3, %v656_v53, %v640_v24 }
  0xb5   : > { %v1166_v7 = vcombine.low %v672_v26, %v674_v6 }
  0xb6   : > { %v504_v8 = vpop.permute.xlu1 %503 }
  0xb7   : > { %1218 = vmatmul.mubr.msk.bf16.gmra.mrb[4].mxu1 %vm703_vm4, %v1166_v7  ;;  %v432_v9 = vpop.permute.xlu0 %431 }
  0xb8   : > { %v521_v10 = vsel %vm511_vm2, %v1470_v60, %v432_v9 }
  0xb9   : > { %v538_v40 = vsel %vm528_vm3, %v521_v10, %v504_v8 }
  0xba   : > { %v1184_v11 = vcombine.low %v536_v33, %v538_v40  ;;  %v436_v12 = vpop.permute.xlu1 %435 }
  0xbb   : > { %v434_v46 = vpop.permute.xlu0 %433  ;;  %v525_v60 = vsel %vm511_vm2, %v1506_v32, %v436_v12 }
  0xbc   : > { %1234 = vmatmul.mubr.msk.bf16.vlgmr.msra.gmra.mrb[0].mxu0 %vm703_vm4, %v1184_v11  ;;  %v523_v13 = vsel %vm511_vm2, %v1493_v16, %v434_v46 }
  0xbe   : > { %v506_v14 = vpop.permute.xlu1 %505 }
  0xbf   : > { %v540_v15 = vsel %vm528_vm3, %v523_v13, %v506_v14  ;;  %v438_v17 = vpop.permute.xlu0 %437 }
  0xc0   : > { %v1174_v18 = vcombine.low %v538_v40, %v540_v15  ;;  %v527_v16 = vsel %vm511_vm2, %v1519_v50, %v438_v17  ;;  %v1192_v50 = vld [vmem:[%s1636_s5] ss:$0 sm:$0xff] }
  0xc2   : > { %v895_v19 = vpop.permute.xlu1 %894  ;;  %1227 = vmatprep.mubr.msk.bf16.mxu1 %vm703_vm4, %v1174_v18 }
  0xc3   : > { %v508_v20 = vpop.permute.xlu0 %507  ;;  %v906_v25 = vsel %vm511_vm2, %v1515_v44, %v895_v19 }
  0xc4   : > { %v542_v21 = vsel %vm528_vm3, %v525_v60, %v508_v20 }
  0xc5   : > { %v1185_v23 = vcombine.low %v540_v15, %v542_v21 }
  0xc6   : > { %v904_v28 = vpop.permute.xlu1 %903 }
  0xc7   : > { %v908_v29 = vsel %vm528_vm3, %v906_v25, %v904_v28  ;;  %1237 = vmatprep.mubr.msk.bf16.mxu0 %vm703_vm4, %v1185_v23  ;;  %v510_v30 = vpop.permute.xlu0 %509 }
  0xc8   : > { %v544_v31 = vsel %vm528_vm3, %v527_v16, %v510_v30 }
  0xc9   : > { %v1175_v32 = vcombine.low %v542_v21, %v544_v31  ;;  %v1186_v35 = vcombine.low %v544_v31, %v908_v29 }
  0xcb   : > { %1228 = vmatmul.mubr.msk.bf16.vlgmr.msra.gmra.mrb[4].mxu1 %vm703_vm4, %v1175_v32  ;;  %1238 = vmatmul.mubr.msk.bf16.gmra.mrb[4].mxu0 %vm703_vm4, %v1186_v35 }
 0x17a   : > { %v1215_v22 = vpop.f32.mrb[0].mxu1 }
 0x17b   : > { %v757_v44 = vpop.f32.mrb[1].mxu1 }
 0x17c   : > { %v1216_v36 = vpop.f32.mrb[2].mxu1 }
 0x17d   : > { %v760_v27 = vpop.f32.mrb[3].mxu1 }
 0x18f   : > { %v1235_v37 = vpop.f32.mrb[0].mxu0 }
 0x190   : > { %v1243_v38 = vadd.f32 %v1235_v37, %v1215_v22  ;;  %v972_v39 = vpop.f32.mrb[1].mxu0 }
 0x191   : > { %v1244_v41 = vadd.f32 %v972_v39, %v757_v44  ;;  %v1236_v33 = vpop.f32.mrb[2].mxu0 }
 0x192   : > { %v1020_v34 = vadd.f32 %v1243_v38, %v1192_v50  ;;  %v1245_v42 = vadd.f32 %v1236_v33, %v1216_v36  ;;  %v975_v43 = vpop.f32.mrb[3].mxu0 }
 0x193   : > { %v1018_v47 = vadd.f32 %v1244_v41, %v1192_v50  ;;  %v1246_v48 = vadd.f32 %v975_v43, %v760_v27 }
 0x194   : > { %vm1028_vm5 = vcmp.gt.f32.partialorder %v1020_v34, 0.0  ;;  %v1036_v51 = vmul.f32 0.1, %v1020_v34  ;;  %v1021_v45 = vadd.f32 %v1245_v42, %v1192_v50 }
 0x195   : > { %vm1026_vm7 = vcmp.gt.f32.partialorder %v1018_v47, 0.0  ;;  %v1034_v52 = vmul.f32 0.1, %v1018_v47  ;;  %v1019_v49 = vadd.f32 %v1246_v48, %v1192_v50 }
 0x196   : > { %v1044_v54 = vsel %vm1028_vm5, %v1020_v34, %v1036_v51  ;;  %vm1029_vm8 = vcmp.gt.f32.partialorder %v1021_v45, 0.0  ;;  %v1037_v55 = vmul.f32 0.1, %v1021_v45 }
 0x197   : > { %1053 = vst.msk [vmem:[%s1610_s27 + $0x10] sm:$0xff] %vm1050_vm6, %v1044_v54  ;;  %v1042_v56 = vsel %vm1026_vm7, %v1018_v47, %v1034_v52  ;;  %vm1027_vm9 = vcmp.gt.f32.partialorder %v1019_v49, 0.0  ;;  %v1035_v59 = vmul.f32 0.1, %v1019_v49 }
 0x198   : > { %1051 = vst.msk [vmem:[%s1610_s27] sm:$0xff] %vm1050_vm6, %v1042_v56  ;;  %v1045_v57 = vsel %vm1029_vm8, %v1021_v45, %v1037_v55 }
 0x199   : > { %1054 = vst.msk [vmem:[%s1610_s27 + $0x18] sm:$0xff] %vm1050_vm6, %v1045_v57  ;;  %v1043_v63 = vsel %vm1027_vm9, %v1019_v49, %v1035_v59 }
 0x19a   : > { %1052 = vst.msk [vmem:[%s1610_s27 + $0x8] sm:$0xff] %vm1050_vm6, %v1043_v63 }
 0x19e   : > { %v1229_v58 = vpop.f32.mrb[4].mxu1  ;;  %v1239_v61 = vpop.f32.mrb[4].mxu0 }
 0x19f   : > { %v1247_v62 = vadd.f32 %v1239_v61, %v1229_v58  ;;  %v878_v0 = vpop.f32.mrb[5].mxu1  ;;  %v988_v1 = vpop.f32.mrb[5].mxu0 }
 0x1a0   : > { %v1248_v3 = vadd.f32 %v988_v1, %v878_v0  ;;  %v1230_v2 = vpop.f32.mrb[6].mxu1  ;;  %v1240_v4 = vpop.f32.mrb[6].mxu0 }
 0x1a1   : > { %v1024_v5 = vadd.f32 %v1247_v62, %v1192_v50  ;;  %v1249_v53 = vadd.f32 %v1240_v4, %v1230_v2  ;;  %v881_v6 = vpop.f32.mrb[7].mxu1  ;;  %v991_v24 = vpop.f32.mrb[7].mxu0 }
 0x1a2   : > { %v1022_v26 = vadd.f32 %v1248_v3, %v1192_v50  ;;  %v1250_v7 = vadd.f32 %v991_v24, %v881_v6 }
 0x1a3   : > { %vm1032_vm10 = vcmp.gt.f32.partialorder %v1024_v5, 0.0  ;;  %v1040_v8 = vmul.f32 0.1, %v1024_v5  ;;  %v1025_v9 = vadd.f32 %v1249_v53, %v1192_v50 }
 0x1a4   : > { %vm1030_vm11 = vcmp.gt.f32.partialorder %v1022_v26, 0.0  ;;  %v1038_v10 = vmul.f32 0.1, %v1022_v26  ;;  %v1023_v40 = vadd.f32 %v1250_v7, %v1192_v50 }
 0x1a5   : > { %v1048_v11 = vsel %vm1032_vm10, %v1024_v5, %v1040_v8  ;;  %vm1033_vm12 = vcmp.gt.f32.partialorder %v1025_v9, 0.0  ;;  %v1041_v12 = vmul.f32 0.1, %v1025_v9 }
 0x1a6   : > { %1057 = vst.msk [vmem:[%s1610_s27 + $0x30] sm:$0xff] %vm1050_vm6, %v1048_v11  ;;  %v1046_v46 = vsel %vm1030_vm11, %v1022_v26, %v1038_v10  ;;  %vm1031_vm13 = vcmp.gt.f32.partialorder %v1023_v40, 0.0  ;;  %v1039_v13 = vmul.f32 0.1, %v1023_v40 }
 0x1a7   : > { %1055 = vst.msk [vmem:[%s1610_s27 + $0x20] sm:$0xff] %vm1050_vm6, %v1046_v46  ;;  %v1049_v14 = vsel %vm1033_vm12, %v1025_v9, %v1041_v12 }
 0x1a8   : > { %1058 = vst.msk [vmem:[%s1610_s27 + $0x38] sm:$0xff] %vm1050_vm6, %v1049_v14  ;;  %v1047_v15 = vsel %vm1031_vm13, %v1023_v40, %v1039_v13 }
 0x1a9   : > { %1056 = vst.msk [vmem:[%s1610_s27 + $0x28] sm:$0xff] %vm1050_vm6, %v1047_v15 }
 0x1aa PF: > { %s16_s21 = sadd.s32 1, %s1280_s21  }
 0x1ab   : > { %p13_p4 = scmp.ge.s32.totalorder %s16_s21, 4  }
 0x1ad   :  { %15 = sbr.rel (!%p13_p4) target bundleno = 1 (0x1), region = 85 }

// kernel: domain_branch_forward.5
= control target key start
LH: loop header
LB: loop body
LE: loop exit
PB: predicated region body
PF: predicated region fallthrough
CT: control target
= control target key end

     0   :  { %s1153_s21 = smov 0   ;;  %s1370_s0 = inlined_call_operand.vmem [shape: f32[2,5,5,32], index: 0, kind: input, shape index: {}]   ;;  %s1371_s1 = inlined_call_operand.vmem [shape: f32[2,5,5,32], index: 1, kind: input, shape index: {}]   ;;  %s1372_s2 = inlined_call_operand.vmem [shape: f32[2,5,5,32], index: 2, kind: input, shape index: {}]   ;;  %s1373_s3 = inlined_call_operand.vmem [shape: f32[2,5,5,32], index: 3, kind: input, shape index: {}]   ;;  %s1374_s4 = inlined_call_operand.vmem [shape: bf16[3,96,32], index: 4, kind: input, shape index: {}]   ;;  %s1375_s5 = inlined_call_operand.vmem [shape: f32[1,32], index: 5, kind: input, shape index: {}]   ;;  %s1376_s6 = inlined_call_operand.vmem [shape: f32[2,16,32], index: 6, kind: output, shape index: {}]  }
   0x1 LB: > { %s944_s22 = sadd.s32 4294967295, %s1111_s21   ;;  %p948_p0 = scmp.ge.s32.totalorder %s1111_s21, 1  ;;  %s1111_s21 = sphi %s1153_s21, %s16_s21  }
   0x2   : > { %p242_p1 = scmp.lt.s32.totalorder %s1111_s21, 3 }
   0x4   : > { %p243_p2 = pnand %p948_p0, %p242_p1 }
   0x5   : > { %p287_p3 = scmp.lt.s32.totalorder (!%p243_p2), %s944_s22, 1  ;;  %v1087_v0 = vld [vmem:[%s1374_s4 + $0x30] sm:$0xff] (!%p243_p2)   ;;  %v1113_v1 = vmov (!%p243_p2), 0.0   ;;  %v1088_v2 = vld [vmem:[%s1374_s4 + $0x38] sm:$0xff] (!%p243_p2)   ;;  %v1089_v3 = vld [vmem:[%s1374_s4 + $0x40] sm:$0xff] (!%p243_p2)   ;;  %s1114_s12 = smov (!%p243_p2), 32  }
   0x6   : > { %246 = sbr.rel (%p243_p2) target bundleno = 400 (0x190), region = 44  ;;  %1025 = vmatprep.subr.bf16.mxu0 (!%p243_p2), %v1113_v1  ;;  %1041 = vmatprep.subr.bf16.mxu1 (!%p243_p2), %v1113_v1  ;;  %v1090_v24 = vld [vmem:[%s1374_s4 + $0x48] sm:$0xff] (!%p243_p2)   ;;  %v1091_v29 = vld [vmem:[%s1374_s4 + $0x50] sm:$0xff] (!%p243_p2)   ;;  %v1092_v38 = vld [vmem:[%s1374_s4] sm:$0xff] (!%p243_p2)   ;;  %s1115_s29 = smov (!%p243_p2), 64   ;;  %vm1116_vm0 = vmmov (!%p243_p2), 0  }
   0x7   : > { %1026 = vmatpush3.bf16.msra.mxu0 (!%p243_p2), %v1087_v0  ;;  %1042 = vmatpush3.bf16.msra.mxu1 (!%p243_p2), %v1092_v38  ;;  %v1094_v43 = vld [vmem:[%s1374_s4 + $0x8] sm:$0xff] (!%p243_p2)   ;;  %v1093_v48 = vld [vmem:[%s1374_s4 + $0x58] sm:$0xff] (!%p243_p2)   ;;  %v1096_v53 = vld [vmem:[%s1374_s4 + $0x10] sm:$0xff] (!%p243_p2)   ;;  %vm397_vm1 = vcmask (!%p243_p2), 261120   ;;  %vm406_vm2 = vcmask (!%p243_p2), 523264   ;;  %vm561_vm3 = vcmask (!%p243_p2), 785408  }
   0x8   : > { %1027 = vmatprep.subr.bf16.mxu0 (!%p243_p2), %v1113_v1  ;;  %1043 = vmatprep.subr.bf16.mxu1 (!%p243_p2), %v1113_v1  ;;  %v1098_v0 = vld [vmem:[%s1374_s4 + $0x18] sm:$0xff] (!%p243_p2)  }
   0x9   : > { %1037 = vmatprep.mubr.msk.bf16.mxu0 (!%p243_p2), %vm1116_vm0, %v1113_v1  ;;  %1053 = vmatprep.mubr.msk.bf16.mxu1 (!%p243_p2), %vm1116_vm0, %v1113_v1 }
   0xb   : > { %1028 = vmatpush3.bf16.msra.mxu0 (!%p243_p2), %v1088_v2  ;;  %1044 = vmatpush3.bf16.msra.mxu1 (!%p243_p2), %v1094_v43 }
   0xc   : > { %1029 = vmatprep.subr.bf16.mxu0 (!%p243_p2), %v1113_v1  ;;  %1045 = vmatprep.subr.bf16.mxu1 (!%p243_p2), %v1113_v1 }
   0xd   : > { %s1378_s22 = smov (!%p287_p3, %s944_s22), 1 }
   0xe   : > { %s1173_s27 = smul.u32 40, %s1378_s22  ;;  %s1003_s8 = sshll.u32 %s1378_s22, 4 }
   0xf   : > { %1030 = vmatpush3.bf16.msra.mxu0 %v1089_v3  ;;  %1046 = vmatpush3.bf16.msra.mxu1 %v1096_v53  ;;  %s311_s11 = scalar_lea.vmem %s1376_s6, %s1003_s8 }
  0x10   : > { %s306_s30 = scalar_lea.vmem %s1373_s3, %s1173_s27  ;;  %s301_s9 = scalar_lea.vmem %s1372_s2, %s1173_s27  ;;  %1031 = vmatprep.subr.bf16.mxu0 %v1113_v1  ;;  %1047 = vmatprep.subr.bf16.mxu1 %v1113_v1 }
  0x11   : > { %v343_v4 = vld [vmem:[%s306_s30 + $0x10] sm:$0x1f]  ;;  %v341_v5 = vld [vmem:[%s306_s30] sm:$0x1f]  ;;  %v344_v6 = vld [vmem:[%s306_s30 + $0x18] sm:$0x1f]  ;;  %s1205_s15 = scalar_lea.vmem %s1370_s0, %s1173_s27  ;;  %s1224_s24 = scalar_lea.vmem %s1371_s1, %s1173_s27 }
  0x12   : > { %v347_v7 = vpack.c.bf16 %v343_v4, %v343_v4  ;;  %v345_v8 = vpack.c.bf16 %v341_v5, %v341_v5  ;;  %v342_v9 = vld [vmem:[%s306_s30 + $0x8] sm:$0x1f]  ;;  %v333_v11 = vld [vmem:[%s301_s9] sm:$0x1f]  ;;  %v348_v12 = vpack.c.bf16 %v344_v6, %v344_v6  ;;  %v336_v15 = vld [vmem:[%s301_s9 + $0x18] sm:$0x1f] }
  0x13   : > { %v334_v10 = vld [vmem:[%s301_s9 + $0x8] sm:$0x1f]  ;;  %v1189_v14 = vpack.c.bf16 %v333_v11, %v333_v11  ;;  %v335_v16 = vld [vmem:[%s301_s9 + $0x10] sm:$0x1f]  ;;  %v346_v17 = vpack.c.bf16 %v342_v9, %v342_v9  ;;  %v1193_v18 = vpack.c.bf16 %v336_v15, %v336_v15  ;;  %v313_v37 = vld [vmem:[%s1205_s15] sm:$0x1f]  ;;  %1032 = vmatpush3.bf16.msra.mxu0 %v1090_v24  ;;  %1048 = vmatpush3.bf16.msra.mxu1 %v1098_v0 }
  0x14   : > { %v1187_v13 = vpack.c.bf16 %v334_v10, %v334_v10  ;;  %435 = vrot.lane.b32.xlu1 %v347_v7, %s1114_s12  ;;  %431 = vrot.lane.b32.xlu0 %v345_v8, %s1114_s12  ;;  %v1195_v19 = vpack.c.bf16 %v335_v16, %v335_v16  ;;  %v314_v34 = vld [vmem:[%s1205_s15 + $0x8] sm:$0x1f]  ;;  %v323_v40 = vld [vmem:[%s1224_s24] sm:$0x1f]  ;;  %v1242_v46 = vpack.c.bf16 %v313_v37, %v313_v37 }
  0x15   : > { %v440_v22 = vshrl.u32 %v1189_v14, 16  ;;  %v442_v23 = vshll.u32 %v1189_v14, 16  ;;  %v463_v25 = vshll.u32 %v1193_v18, 16  ;;  %v461_v30 = vshrl.u32 %v1193_v18, 16  ;;  %1033 = vmatprep.subr.bf16.mxu0 %v1113_v1  ;;  %v324_v39 = vld [vmem:[%s1224_s24 + $0x8] sm:$0x1f]  ;;  %1049 = vmatprep.subr.bf16.mxu1 %v1113_v1 }
  0x16   : > { %v447_v20 = vshrl.u32 %v1187_v13, 16  ;;  %v449_v21 = vshll.u32 %v1187_v13, 16  ;;  %v456_v26 = vshll.u32 %v1195_v19, 16  ;;  %v454_v32 = vshrl.u32 %v1195_v19, 16  ;;  %v316_v42 = vld [vmem:[%s1205_s15 + $0x18] sm:$0x1f] }
  0x17   : > { %v444_v28 = vrot.slane %v442_v23, 1  ;;  %v465_v31 = vrot.slane %v463_v25, 1  ;;  %v1234_v41 = vpack.c.bf16 %v314_v34, %v314_v34  ;;  %v315_v47 = vld [vmem:[%s1205_s15 + $0x10] sm:$0x1f]  ;;  %1034 = vmatpush3.bf16.msra.mxu0 %v1091_v29  ;;  %v326_v49 = vld [vmem:[%s1224_s24 + $0x18] sm:$0x1f]  ;;  %v1250_v50 = vpack.c.bf16 %v316_v42, %v316_v42 }
  0x18   : > { %v451_v27 = vrot.slane %v449_v21, 1  ;;  %437 = vrot.lane.b32.xlu1 %v348_v12, %s1114_s12  ;;  %433 = vrot.lane.b32.xlu0 %v346_v17, %s1114_s12  ;;  %v458_v33 = vrot.slane %v456_v26, 1  ;;  %v325_v51 = vld [vmem:[%s1224_s24 + $0x10] sm:$0x1f]  ;;  %v329_v54 = vpack.c.bf16 %v324_v39, %v324_v39  ;;  %v328_v55 = vpack.c.bf16 %v323_v40, %v323_v40  ;;  %v317_v58 = vld [vmem:[%s1205_s15 + $0x20] sm:$0x1f] }
  0x19   : > { %v445_v36 = vor.u32 %v444_v28, %v440_v22  ;;  %v466_v44 = vor.u32 %v465_v31, %v461_v30  ;;  %1035 = vmatprep.subr.bf16.mxu0 %v1113_v1  ;;  %v371_v52 = vshll.u32 %v1234_v41, 16  ;;  %v364_v56 = vshll.u32 %v1242_v46, 16  ;;  %v1100_v9 = vld [vmem:[%s1374_s4 + $0x20] sm:$0xff]   ;;  %v1102_v16 = vld [vmem:[%s1374_s4 + $0x28] sm:$0xff]  }
  0x1a   : > { %v452_v35 = vor.u32 %v451_v27, %v447_v20  ;;  %v459_v45 = vor.u32 %v458_v33, %v454_v32  ;;  %v1265_v57 = vpack.c.bf16 %v315_v47, %v315_v47  ;;  %v369_v59 = vshrl.u32 %v1234_v41, 16  ;;  %1050 = vmatpush3.bf16.msra.mxu1 %v1100_v9  ;;  %v327_v23 = vld [vmem:[%s1224_s24 + $0x20] sm:$0x1f]  ;;  %v1101_v9 = vld [vmem:[%s1374_s4 + $0x78] sm:$0xff]  }
  0x1b   : > { %1036 = vmatpush3.bf16.msra.mxu0 %v1093_v48  ;;  %v362_v60 = vshrl.u32 %v1242_v46, 16  ;;  %v385_v61 = vshll.u32 %v1250_v50, 16  ;;  %v331_v62 = vpack.c.bf16 %v326_v49, %v326_v49  ;;  %v373_v63 = vrot.slane %v371_v52, 1  ;;  %1051 = vmatprep.subr.bf16.mxu1 %v1113_v1 }
  0x1c   : > { %469 = vrot.lane.b32.xlu1 %v452_v35, %s1115_s29  ;;  %467 = vrot.lane.b32.xlu0 %v445_v36, %s1115_s29  ;;  %v330_v2 = vpack.c.bf16 %v325_v51, %v325_v51  ;;  %v366_v3 = vrot.slane %v364_v56, 1  ;;  %v378_v4 = vshll.u32 %v1265_v57, 16  ;;  %v1279_v5 = vpack.c.bf16 %v317_v58, %v317_v58  ;;  %v1097_v58 = vld [vmem:[%s1374_s4 + $0x68] sm:$0xff]  }
  0x1d   : > { %1057 = vmatprep.subr.bf16.mxu0 %v1113_v1  ;;  %v383_v6 = vshrl.u32 %v1250_v50, 16  ;;  %v374_v7 = vor.u32 %v373_v63, %v369_v59  ;;  %v387_v8 = vrot.slane %v385_v61, 1  ;;  %v376_v11 = vshrl.u32 %v1265_v57, 16 }
  0x1e   : > { %v367_v10 = vor.u32 %v366_v3, %v362_v60  ;;  %v380_v12 = vrot.slane %v378_v4, 1  ;;  %v713_v15 = vshll.u32 %v1279_v5, 16  ;;  %v711_v21 = vshrl.u32 %v1279_v5, 16  ;;  %1052 = vmatpush3.bf16.msra.mxu1 %v1102_v16  ;;  %v1103_v16 = vld [vmem:[%s1374_s4 + $0x80] sm:$0xff]  }
  0x1f   : > { %v388_v17 = vor.u32 %v387_v8, %v383_v6  ;;  %v332_v24 = vpack.c.bf16 %v327_v23, %v327_v23  ;;  %v1117_v30 = vmov 1983009808   ;;  %v513_v32 = vlaneseq  ;;  %v1104_v23 = vld [vmem:[%s1374_s4 + $0x88] sm:$0xff]  }
  0x20   : > { %473 = vrot.lane.b32.xlu1 %v466_v44, %s1115_s29  ;;  %471 = vrot.lane.b32.xlu0 %v459_v45, %s1115_s29  ;;  %v381_v20 = vor.u32 %v380_v12, %v376_v11  ;;  %v715_v22 = vrot.slane %v713_v15, 1  ;;  %v511_v31 = vunpack.c.l.s4 %v1117_v30 }
  0x21   : > { %v514_v37 = vshrl.u32 %v513_v32, 7 }
  0x22   : > { %v716_v25 = vor.u32 %v715_v22, %v711_v21  ;;  %v512_v36 = vunpack.c.0.s8 %v511_v31 }
  0x24   : > { %355 = vrot.lane.b32.xlu1 %v329_v54, %s1114_s12  ;;  %353 = vrot.lane.b32.xlu0 %v328_v55, %s1114_s12  ;;  %v515_v44 = vsub.s32 %v512_v36, %v514_v37 }
  0x28   : > { %359 = vrot.lane.b32.xlu1 %v331_v62, %s1114_s12  ;;  %357 = vrot.lane.b32.xlu0 %v330_v2, %s1114_s12  ;;  %v1099_v2 = vld [vmem:[%s1374_s4 + $0x70] sm:$0xff]  }
  0x2c   : > { %391 = vrot.lane.b32.xlu1 %v374_v7, %s1115_s29  ;;  %389 = vrot.lane.b32.xlu0 %v367_v10, %s1115_s29 }
  0x30   : > { %395 = vrot.lane.b32.xlu1 %v388_v17, %s1115_s29  ;;  %393 = vrot.lane.b32.xlu0 %v381_v20, %s1115_s29 }
  0x34   : > { %708 = vrot.lane.b32.xlu0 %v332_v24, %s1114_s12  ;;  %717 = vrot.lane.b32.xlu1 %v716_v25, %s1115_s29 }
  0x86   : > { %v436_v26 = vpop.permute.xlu1 %435  ;;  %v432_v27 = vpop.permute.xlu0 %431 }
  0x87   : > { %v476_v33 = vsel %vm397_vm1, %v1189_v14, %v432_v27  ;;  %v480_v42 = vsel %vm397_vm1, %v1195_v19, %v436_v26  ;;  %v1095_v19 = vld [vmem:[%s1374_s4 + $0x60] sm:$0xff]  }
  0x8a   : > { %v438_v28 = vpop.permute.xlu1 %437  ;;  %v434_v29 = vpop.permute.xlu0 %433 }
  0x8b   : > { %v478_v34 = vsel %vm397_vm1, %v1187_v13, %v434_v29  ;;  %v482_v43 = vsel %vm397_vm1, %v1193_v18, %v438_v28 }
  0x8e   : > { %v470_v35 = vpop.permute.xlu1 %469  ;;  %v468_v38 = vpop.permute.xlu0 %467 }
  0x8f   : > { %v486_v39 = vsel %vm406_vm2, %v478_v34, %v470_v35  ;;  %v484_v40 = vsel %vm406_vm2, %v476_v33, %v468_v38 }
  0x90   : > { %v508_v45 = vcombine.low %v484_v40, %v486_v39 }
  0x92   : > { %v474_v14 = vpop.permute.xlu1 %473  ;;  %v472_v47 = vpop.permute.xlu0 %471  ;;  %v516_v51 = vrot.slane %v508_v45, %v515_v44 }
  0x93   : > { %v490_v13 = vsel %vm406_vm2, %v482_v43, %v474_v14  ;;  %v488_v48 = vsel %vm406_vm2, %v480_v42, %v472_v47 }
  0x94   : > { %v509_v49 = vcombine.low %v488_v48, %v490_v13 }
  0x96   : > { %v523_v52 = vrot.slane %v509_v49, %v515_v44  ;;  %v356_v53 = vpop.permute.xlu1 %355  ;;  %v354_v54 = vpop.permute.xlu0 %353 }
  0x97   : > { %v401_v59 = vsel %vm397_vm1, %v1234_v41, %v356_v53  ;;  %v399_v60 = vsel %vm397_vm1, %v1242_v46, %v354_v54 }
  0x98   : > { %v524_v55 = vcombine.low %v516_v51, %v523_v52 }
  0x9a   : > { %1038 = vmatmul.mubr.msk.bf16.vlgmr.msra.gmra.mrb[0].mxu0 %vm561_vm3, %v524_v55  ;;  %v360_v18 = vpop.permute.xlu1 %359  ;;  %v358_v56 = vpop.permute.xlu0 %357 }
  0x9b   : > { %1058 = vmatpush3.bf16.msra.mxu0 %v1095_v19  ;;  %1069 = vmatprep.mubr.msk.bf16.mxu0 %vm1116_vm0, %v1113_v1  ;;  %v405_v3 = vsel %vm397_vm1, %v1250_v50, %v360_v18  ;;  %v403_v41 = vsel %vm397_vm1, %v1265_v57, %v358_v56 }
  0x9c   : > { %1059 = vmatprep.subr.bf16.mxu0 %v1113_v1 }
  0x9e   : > { %v392_v61 = vpop.permute.xlu1 %391  ;;  %v390_v62 = vpop.permute.xlu0 %389 }
  0x9f   : > { %1060 = vmatpush3.bf16.msra.mxu0 %v1097_v58  ;;  %v410_v63 = vsel %vm406_vm2, %v401_v59, %v392_v61  ;;  %v408_v0 = vsel %vm406_vm2, %v399_v60, %v390_v62 }
  0xa0   : > { %1061 = vmatprep.subr.bf16.mxu0 %v1113_v1  ;;  %v610_v46 = vcombine.low %v408_v0, %v410_v63 }
  0xa2   : > { %v396_v4 = vpop.permute.xlu1 %395  ;;  %v394_v6 = vpop.permute.xlu0 %393  ;;  %v618_v11 = vrot.slane %v610_v46, %v515_v44 }
  0xa3   : > { %1062 = vmatpush3.bf16.msra.mxu0 %v1099_v2  ;;  %v414_v7 = vsel %vm406_vm2, %v405_v3, %v396_v4  ;;  %v412_v8 = vsel %vm406_vm2, %v403_v41, %v394_v6 }
  0xa4   : > { %v611_v10 = vcombine.low %v412_v8, %v414_v7  ;;  %1063 = vmatprep.subr.bf16.mxu0 %v1113_v1  ;;  %v737_v22 = vcombine.low %v410_v63, %v412_v8 }
  0xa6   : > { %v625_v50 = vrot.slane %v611_v10, %v515_v44  ;;  %v709_v12 = vpop.permute.xlu0 %708  ;;  %v718_v15 = vpop.permute.xlu1 %717 }
  0xa7   : > { %1064 = vmatpush3.bf16.msra.mxu0 %v1101_v9  ;;  %v720_v57 = vsel %vm397_vm1, %v1279_v5, %v709_v12  ;;  %v745_v5 = vrot.slane %v737_v22, %v515_v44 }
  0xa8   : > { %v626_v17 = vcombine.low %v618_v11, %v625_v50  ;;  %v722_v20 = vsel %vm406_vm2, %v720_v57, %v718_v15  ;;  %1065 = vmatprep.subr.bf16.mxu0 %v1113_v1 }
  0xa9   : > { %v738_v21 = vcombine.low %v414_v7, %v722_v20 }
  0xaa   : > { %1054 = vmatmul.mubr.msk.bf16.vlgmr.msra.gmra.mrb[0].mxu1 %vm561_vm3, %v626_v17 }
  0xab   : > { %1066 = vmatpush3.bf16.msra.mxu0 %v1103_v16  ;;  %v752_v24 = vrot.slane %v738_v21, %v515_v44 }
  0xac   : > { %1067 = vmatprep.subr.bf16.mxu0 %v1113_v1  ;;  %v1000_v1 = vld [vmem:[%s1375_s5] ss:$0 sm:$0xff] }
  0xad   : > { %v753_v25 = vcombine.low %v745_v5, %v752_v24 }
  0xaf   : > { %1068 = vmatpush3.bf16.msra.mxu0 %v1104_v23 }
  0xb2   : > { %1070 = vmatmul.mubr.msk.bf16.vlgmr.msra.gmra.mrb[4].mxu0 %vm561_vm3, %v753_v25 }
 0x16d   : > { %v599_v26 = vpop.f32.mrb[0].mxu0 }
 0x16e   : > { %v1039_v27 = vpop.f32.mrb[1].mxu0 }
 0x16f   : > { %v602_v28 = vpop.f32.mrb[2].mxu0 }
 0x170   : > { %v1040_v29 = vpop.f32.mrb[3].mxu0 }
 0x17d   : > { %v700_v30 = vpop.f32.mrb[0].mxu1 }
 0x17e   : > { %v701_v31 = vadd.f32 %v700_v30, %v599_v26  ;;  %v1055_v32 = vpop.f32.mrb[1].mxu1 }
 0x17f   : > { %v703_v33 = vpop.f32.mrb[2].mxu1 }
 0x180   : > { %v704_v34 = vadd.f32 %v703_v33, %v602_v28  ;;  %v1056_v35 = vpop.f32.mrb[3].mxu1 }
 0x185   : > { %v827_v36 = vpop.f32.mrb[4].mxu0 }
 0x186   : > { %v834_v37 = vadd.f32 %v827_v36, %v701_v31  ;;  %v1071_v38 = vpop.f32.mrb[5].mxu0 }
 0x187   : > { %v830_v39 = vpop.f32.mrb[6].mxu0 }
 0x188   : > { %v843_v40 = vadd.f32 %v1000_v1, %v834_v37  ;;  %v835_v42 = vadd.f32 %v830_v39, %v704_v34  ;;  %v1072_v43 = vpop.f32.mrb[7].mxu0 }
 0x18a   : > { %vm845_vm4 = vcmp.gt.f32.partialorder %v843_v40, 0.0  ;;  %v847_v44 = vmul.f32 0.1, %v843_v40  ;;  %v844_v45 = vadd.f32 %v1000_v1, %v835_v42 }
 0x18c   : > { %v849_v14 = vsel %vm845_vm4, %v843_v40, %v847_v44  ;;  %vm846_vm5 = vcmp.gt.f32.partialorder %v844_v45, 0.0  ;;  %v848_v47 = vmul.f32 0.1, %v844_v45 }
 0x18d   : > { %851 = vst.msk [vmem:[%s311_s11] sm:$0xff] %vm397_vm1, %v849_v14 }
 0x18e   : > { %v850_v13 = vsel %vm846_vm5, %v844_v45, %v848_v47 }
 0x18f   : > { %852 = vst.msk [vmem:[%s311_s11 + $0x8] sm:$0xff] %vm397_vm1, %v850_v13 }
 0x190 PF: > { %s16_s21 = sadd.s32 1, %s1111_s21  }
 0x191   : > { %p13_p4 = scmp.ge.s32.totalorder %s16_s21, 4  }
 0x193   :  { %15 = sbr.rel (!%p13_p4) target bundleno = 1 (0x1), region = 85 }

// kernel: domain_branch_forward.6
= control target key start
LH: loop header
LB: loop body
LE: loop exit
PB: predicated region body
PF: predicated region fallthrough
CT: control target
= control target key end

     0   :  { %s1660_s24 = smov 0   ;;  %s1949_s0 = inlined_call_operand.vmem [shape: f32[2,24,32], index: 0, kind: input, shape index: {}]   ;;  %s1950_s1 = inlined_call_operand.vmem [shape: bf16[3,96,32], index: 1, kind: input, shape index: {}]   ;;  %s1951_s2 = inlined_call_operand.vmem [shape: f32[1,32], index: 2, kind: input, shape index: {}]   ;;  %s1952_s3 = inlined_call_operand.vmem [shape: bf16[3,96,32], index: 3, kind: input, shape index: {}]   ;;  %s1953_s4 = inlined_call_operand.vmem [shape: f32[1,32], index: 4, kind: input, shape index: {}]   ;;  %s1954_s5 = inlined_call_operand.vmem [shape: f32[2,32], index: 5, kind: input, shape index: {}]   ;;  %s1955_s6 = inlined_call_operand.vmem [shape: f32[2,32], index: 6, kind: input, shape index: {}]   ;;  %s1956_s7 = inlined_call_operand.vmem [shape: f32[2,24,32], index: 7, kind: output, shape index: {}]  }
   0x1 LB: > { %s1299_s25 = sadd.s32 4294967295, %s1615_s24   ;;  %p1303_p0 = scmp.ge.s32.totalorder %s1615_s24, 1  ;;  %s1615_s24 = sphi %s1660_s24, %s17_s24  }
   0x2   : > { %p237_p1 = scmp.lt.s32.totalorder %s1615_s24, 3 }
   0x4   : > { %p238_p2 = pnand %p1303_p0, %p237_p1 }
   0x5   : > { %p269_p3 = scmp.lt.s32.totalorder (!%p238_p2), %s1299_s25, 1  ;;  %vm347_vm0 = vsmask.f32 (!%p238_p2), 3328  ;;  %v1569_v0 = vld [vmem:[%s1950_s1] sm:$0xff] (!%p238_p2)   ;;  %v1570_v1 = vld [vmem:[%s1950_s1 + $0x30] sm:$0xff] (!%p238_p2)   ;;  %v1571_v2 = vld [vmem:[%s1950_s1 + $0x8] sm:$0xff] (!%p238_p2)  }
   0x6   : > { %241 = sbr.rel (%p238_p2) target bundleno = 1007 (0x3ef), region = 48  ;;  %1471 = vmatprep.subr.bf16.mxu1 (!%p238_p2), %v1569_v0  ;;  %1455 = vmatprep.subr.bf16.mxu0 (!%p238_p2), %v1570_v1  ;;  %v1572_v3 = vld [vmem:[%s1950_s1 + $0x38] sm:$0xff] (!%p238_p2)   ;;  %v1573_v4 = vld [vmem:[%s1950_s1 + $0x10] sm:$0xff] (!%p238_p2)   ;;  %vm371_vm1 = vsmask.f32 (!%p238_p2), 7424  ;;  %v1574_v10 = vld [vmem:[%s1950_s1 + $0x40] sm:$0xff] (!%p238_p2)  }
   0x7   : > { %1472 = vmatpush3.bf16.msra.mxu1 (!%p238_p2), %v1569_v0  ;;  %1456 = vmatpush3.bf16.msra.mxu0 (!%p238_p2), %v1570_v1  ;;  %vm367_vm2 = vcmask (!%p238_p2), 1043456   ;;  %v1575_v11 = vld [vmem:[%s1950_s1 + $0x18] sm:$0xff] (!%p238_p2)   ;;  %vm370_vm3 = vcmask (!%p238_p2), 1047552   ;;  %v1576_v16 = vld [vmem:[%s1950_s1 + $0x48] sm:$0xff] (!%p238_p2)   ;;  %v1577_v22 = vld [vmem:[%s1950_s1 + $0x20] sm:$0xff] (!%p238_p2)   ;;  %vm395_vm6 = vcmask (!%p238_p2), 1046528  }
   0x8   : > { %1473 = vmatprep.subr.bf16.mxu1 (!%p238_p2), %v1571_v2  ;;  %1457 = vmatprep.subr.bf16.mxu0 (!%p238_p2), %v1572_v3  ;;  %vm1712_vm4 = vmand (!%p238_p2), %vm367_vm2, %vm347_vm0  ;;  %v1578_v26 = vld [vmem:[%s1950_s1 + $0x50] sm:$0xff] (!%p238_p2)   ;;  %v1579_v29 = vld [vmem:[%s1950_s1 + $0x28] sm:$0xff] (!%p238_p2)   ;;  %s1617_s11 = smov (!%p238_p2), 64   ;;  %v1618_v43 = vmov (!%p238_p2), 0   ;;  %vm1961_vm7 = vcmask (!%p238_p2), 261120   ;;  %vm1960_vm8 = vcmask (!%p238_p2), 523264  }
   0x9   : > { %vm1720_vm5 = vmand (!%p238_p2), %vm370_vm3, %vm371_vm1  ;;  %v1580_v37 = vld [vmem:[%s1950_s1 + $0x58] sm:$0xff] (!%p238_p2)   ;;  %v1741_v44 = vrot.slane (!%p238_p2), %v1618_v43, 1  ;;  %v1581_v45 = vld [vmem:[%s1950_s1 + $0x60] sm:$0xff] (!%p238_p2)   ;;  %vm1959_vm9 = vcmask (!%p238_p2), 785408   ;;  %vm1958_vm10 = vcmask (!%p238_p2), 1044480   ;;  %vm1957_vm11 = vcmask (!%p238_p2), 1041408  }
   0xa   : > { %v1582_v61 = vld [vmem:[%s1950_s1 + $0x68] sm:$0xff] (!%p238_p2)   ;;  %v1583_v1 = vld [vmem:[%s1950_s1 + $0x70] sm:$0xff] (!%p238_p2)  }
   0xb   : > { %1474 = vmatpush3.bf16.msra.mxu1 (!%p238_p2), %v1571_v2  ;;  %1458 = vmatpush3.bf16.msra.mxu0 (!%p238_p2), %v1572_v3 }
   0xc   : > { %1475 = vmatprep.subr.bf16.mxu1 (!%p238_p2), %v1573_v4  ;;  %1459 = vmatprep.subr.bf16.mxu0 (!%p238_p2), %v1574_v10 }
   0xd   : > { %s1994_s25 = smov (!%p269_p3, %s1299_s25), 1 }
   0xe   : > { %s1551_s30 = smul.u32 24, %s1994_s25 }
   0xf   : > { %1476 = vmatpush3.bf16.msra.mxu1 %v1573_v4  ;;  %1460 = vmatpush3.bf16.msra.mxu0 %v1574_v10  ;;  %v1585_v10 = vld [vmem:[%s1950_s1 + $0x80] sm:$0xff]  }
  0x10   : > { %s273_s14 = scalar_lea.vmem %s1949_s0, %s1551_s30  ;;  %1477 = vmatprep.subr.bf16.mxu1 %v1575_v11  ;;  %1461 = vmatprep.subr.bf16.mxu0 %v1576_v16  ;;  %s278_s15 = scalar_lea.vmem %s1956_s7, %s1551_s30 }
  0x11   : > { %v1691_v5 = vld [vmem:[%s273_s14] sm:$0xff]  ;;  %v1693_v6 = vld [vmem:[%s273_s14 + $0x8] sm:$0xff]  ;;  %v1695_v7 = vld [vmem:[%s273_s14 + $0x10] sm:$0xff]  ;;  %s1619_s14 = smov 32  }
  0x12   : > { %v344_v8 = vpack.c.bf16 %v1693_v6, %v1691_v5  ;;  %v345_v9 = vpack.c.bf16 %v1695_v7, %v1695_v7 }
  0x13   : > { %1478 = vmatpush3.bf16.msra.mxu1 %v1575_v11  ;;  %1462 = vmatpush3.bf16.msra.mxu0 %v1576_v16 }
  0x14   : > { %v349_v12 = vshrl.u32 %v344_v8, 16  ;;  %v352_v13 = vshll.u32 %v344_v8, 16  ;;  %v357_v14 = vshrl.u32 %v345_v9, 16  ;;  %v360_v15 = vshll.u32 %v345_v9, 16  ;;  %1479 = vmatprep.subr.bf16.mxu1 %v1577_v22  ;;  %1463 = vmatprep.subr.bf16.mxu0 %v1578_v26  ;;  %v1584_v8 = vld [vmem:[%s1950_s1 + $0x78] sm:$0xff]  }
  0x16   : > { %v351_v17 = vrot.slane %v349_v12, 4  ;;  %v354_v18 = vrot.slane %v352_v13, 5  ;;  %v359_v19 = vrot.slane %v357_v14, 4  ;;  %v362_v20 = vrot.slane %v360_v15, 5  ;;  %v1586_v13 = vld [vmem:[%s1950_s1 + $0x88] sm:$0xff]  }
  0x17   : > { %1480 = vmatpush3.bf16.msra.mxu1 %v1577_v22  ;;  %1464 = vmatpush3.bf16.msra.mxu0 %v1578_v26  ;;  %v1591_v22 = vld [vmem:[%s1952_s3 + $0x10] sm:$0xff]   ;;  %v1594_v26 = vld [vmem:[%s1952_s3 + $0x48] sm:$0xff]  }
  0x18   : > { %v355_v23 = vor.u32 %v354_v18, %v351_v17  ;;  %v363_v24 = vor.u32 %v362_v20, %v359_v19  ;;  %1481 = vmatprep.subr.bf16.mxu1 %v1579_v29  ;;  %1465 = vmatprep.subr.bf16.mxu0 %v1580_v37  ;;  %v1587_v17 = vld [vmem:[%s1952_s3] sm:$0xff]   ;;  %v1588_v18 = vld [vmem:[%s1952_s3 + $0x30] sm:$0xff]   ;;  %v1589_v19 = vld [vmem:[%s1952_s3 + $0x8] sm:$0xff]  }
  0x19   : > { %v1590_v20 = vld [vmem:[%s1952_s3 + $0x38] sm:$0xff]  }
  0x1a   : > { %v364_v27 = vsel %vm347_vm0, %v355_v23, %v363_v24  ;;  %v369_v28 = vsel %vm1712_vm4, 0, %v355_v23  ;;  %v1592_v23 = vld [vmem:[%s1952_s3 + $0x40] sm:$0xff]   ;;  %v1593_v24 = vld [vmem:[%s1952_s3 + $0x18] sm:$0xff]  }
  0x1b   : > { %v373_v30 = vsel %vm1720_vm5, %v364_v27, 0  ;;  %v375_v31 = vshrl.u32 %v369_v28, 16  ;;  %v377_v32 = vshll.u32 %v369_v28, 16  ;;  %v396_v33 = vrot.slane %v369_v28, 1  ;;  %1482 = vmatpush3.bf16.msra.mxu1 %v1579_v29  ;;  %1466 = vmatpush3.bf16.msra.mxu0 %v1580_v37  ;;  %v1595_v27 = vld [vmem:[%s1952_s3 + $0x20] sm:$0xff]  }
  0x1c   : > { %v382_v34 = vshll.u32 %v373_v30, 16  ;;  %v397_v35 = vrot.slane %v373_v30, 1  ;;  %v386_v40 = vshrl.u32 %v373_v30, 16  ;;  %1487 = vmatprep.subr.bf16.mxu0 %v1581_v45  ;;  %1503 = vmatprep.subr.bf16.mxu1 %v1588_v18 }
  0x1d   : > { %v379_v36 = vrot.slane %v377_v32, 1 }
  0x1e   : > { %v384_v38 = vrot.slane %v382_v34, 1  ;;  %v398_v39 = vsel %vm395_vm6, %v396_v33, %v397_v35  ;;  %v637_v48 = vsel %vm395_vm6, %v397_v35, %v1741_v44 }
  0x1f   : > { %v380_v41 = vor.u32 %v379_v36, %v375_v31  ;;  %399 = vrot.lane.b32.xlu1 %v398_v39, %s1617_s11 }
  0x20   : > { %v388_v46 = vor.u32 %v386_v40, %v384_v38 }
  0x21   : > { %v385_v42 = vsel %vm371_vm1, %v380_v41, %v384_v38 }
  0x22   : > { %389 = vrot.lane.b32.xlu0 %v385_v42, %s1619_s14  ;;  %v627_v47 = vsel %vm371_vm1, %v388_v46, %v1741_v44 }
  0x23   : > { %401 = vrot.lane.b32.xlu1 %v397_v35, %s1617_s11 }
  0x26   : > { %391 = vrot.lane.b32.xlu0 %v388_v46, %s1619_s14 }
  0x27   : > { %633 = vrot.lane.b32.xlu1 %v1741_v44, %s1619_s14 }
  0x2a   : > { %631 = vrot.lane.b32.xlu0 %v627_v47, %s1619_s14 }
  0x2b   : > { %640 = vrot.lane.b32.xlu1 %v1741_v44, %s1617_s11 }
  0x2e   : > { %638 = vrot.lane.b32.xlu0 %v637_v48, %s1617_s11 }
  0x91   : > { %v400_v49 = vpop.permute.xlu1 %399 }
  0x94   : > { %v390_v50 = vpop.permute.xlu0 %389 }
  0x95   : > { %v405_v51 = vsel %vm1961_vm7, %v369_v28, %v390_v50  ;;  %v402_v53 = vpop.permute.xlu1 %401  ;;  %v283_v28 = vlaneseq }
  0x96   : > { %v410_v52 = vsel %vm1960_vm8, %v405_v51, %v400_v49 }
  0x97   : > { %1483 = vmatprep.mubr.msk.bf16.mxu1 %vm1959_vm9, %v410_v52  ;;  %v441_v57 = vrot.slane %v410_v52, 3  ;;  %v666_v2 = vrot.slane %v410_v52, 6  ;;  %v284_v29 = vshrl.u32 %v283_v28, 7 }
  0x98   : > { %v392_v54 = vpop.permute.xlu0 %391 }
  0x99   : > { %v407_v55 = vsel %vm1961_vm7, %v373_v30, %v392_v54  ;;  %v634_v9 = vpop.permute.xlu1 %633  ;;  %v285_v32 = vadd.s32 8, %v284_v29  ;;  %v1826_v38 = vmul.u32.u64.low 2863311531, %v284_v29  ;;  %v1827_v39 = vmul.u32.u64.high 2863311531, %v284_v29, %v1826_v38 }
  0x9a   : > { %v412_v56 = vsel %vm1960_vm8, %v407_v55, %v402_v53  ;;  %v645_v11 = vsel %vm1961_vm7, 0, %v634_v9 }
  0x9b   : > { %v442_v58 = vrot.slane %v412_v56, 3  ;;  %1484 = vmatmul.mubr.msk.bf16.vlgmr.msra.gmra.mrb[0].mxu1 %vm1959_vm9, %v412_v56  ;;  %v1829_v41 = vmul.u32.u64.low 2863311531, %v285_v32  ;;  %v1830_v42 = vmul.u32.u64.high 2863311531, %v285_v32, %v1829_v41  ;;  %v293_v51 = vshrl.u32 %v1827_v39, 2 }
  0x9c   : > { %v632_v59 = vpop.permute.xlu0 %631  ;;  %1504 = vmatpush3.bf16.msra.mxu1 %v1588_v18 }
  0x9d   : > { %v443_v60 = vsel %vm1958_vm10, %v441_v57, %v442_v58  ;;  %v643_v62 = vsel %vm1961_vm7, %v373_v30, %v632_v59  ;;  %v641_v12 = vpop.permute.xlu1 %640  ;;  %1505 = vmatprep.subr.bf16.mxu1 %v1590_v20  ;;  %v286_v30 = vadd.s32 16, %v284_v29  ;;  %v304_v52 = vshrl.u32 %v1830_v42, 2 }
  0x9e   : > { %1467 = vmatprep.mubr.msk.bf16.mxu0 %vm1959_vm9, %v443_v60  ;;  %v1789_v14 = vsel %vm1960_vm8, %v645_v11, %v641_v12  ;;  %v294_v54 = vmul.u32 6, %v293_v51  ;;  %v1599_v51 = vld [vmem:[%s1952_s3 + $0x60] sm:$0xff]  }
  0x9f   : > { %1468 = vmatmul.mubr.msk.bf16.vlgmr.msra.gmra.mrb[0].mxu0 %vm1959_vm9, %v442_v58  ;;  %v669_v15 = vrot.slane %v1789_v14, 6  ;;  %v1823_v34 = vmul.u32.u64.low 2863311531, %v286_v30  ;;  %v1824_v35 = vmul.u32.u64.high 2863311531, %v286_v30, %v1823_v34  ;;  %v305_v55 = vmul.u32 6, %v304_v52  ;;  %v1403_v14 = vld [vmem:[%s1953_s4] ss:$0 sm:$0xff] }
  0xa0   : > { %1488 = vmatpush3.bf16.msra.mxu0 %v1581_v45  ;;  %v639_v63 = vpop.permute.xlu0 %638  ;;  %1506 = vmatpush3.bf16.msra.mxu1 %v1590_v20  ;;  %v295_v57 = vsub.s32 %v284_v29, %v294_v54 }
  0xa1   : > { %v647_v0 = vsel %vm1960_vm8, %v643_v62, %v639_v63  ;;  %1489 = vmatprep.subr.bf16.mxu0 %v1582_v61  ;;  %1507 = vmatprep.subr.bf16.mxu1 %v1592_v23  ;;  %v315_v50 = vshrl.u32 %v1824_v35, 2  ;;  %v306_v58 = vsub.s32 %v285_v32, %v305_v55  ;;  %v1354_v63 = vld [vmem:[%s1951_s2] ss:$0 sm:$0xff]  ;;  %v1596_v35 = vld [vmem:[%s1952_s3 + $0x50] sm:$0xff]  }
  0xa2   : > { %v667_v3 = vrot.slane %v647_v0, 6  ;;  %vm320_vm14 = vcmp.ne.s32.totalorder %v295_v57, 0  ;;  %vm323_vm15 = vcmp.lt.s32.totalorder %v295_v57, 0  ;;  %v329_v60 = vadd.s32 6, %v295_v57 }
  0xa3   : > { %v316_v53 = vmul.u32 6, %v315_v50  ;;  %vm321_vm3 = vcmp.ne.s32.totalorder %v306_v58, 0  ;;  %vm326_vm10 = vmand %vm323_vm15, %vm320_vm14 }
  0xa4   : > { %1490 = vmatpush3.bf16.msra.mxu0 %v1582_v61  ;;  %v668_v4 = vsel %vm1957_vm11, %v666_v2, %v667_v3  ;;  %v670_v16 = vsel %vm1957_vm11, %v667_v3, %v669_v15  ;;  %1508 = vmatpush3.bf16.msra.mxu1 %v1592_v23  ;;  %vm324_vm11 = vcmp.lt.s32.totalorder %v306_v58, 0  ;;  %v330_v61 = vadd.s32 6, %v306_v58 }
  0xa5   : > { %1499 = vmatprep.mubr.msk.bf16.mxu0 %vm1959_vm9, %v668_v4  ;;  %1491 = vmatprep.subr.bf16.mxu0 %v1583_v1  ;;  %v317_v56 = vsub.s32 %v286_v30, %v316_v53  ;;  %v332_v2 = vsel %vm326_vm10, %v329_v60, %v295_v57 }
  0xa6   : > { %1509 = vmatprep.subr.bf16.mxu1 %v1594_v26 }
  0xa7   : > { %vm322_vm12 = vcmp.ne.s32.totalorder %v317_v56, 0  ;;  %vm325_vm13 = vcmp.lt.s32.totalorder %v317_v56, 0  ;;  %v331_v59 = vadd.s32 6, %v317_v56 }
  0xa8   : > { %1492 = vmatpush3.bf16.msra.mxu0 %v1583_v1  ;;  %1510 = vmatpush3.bf16.msra.mxu1 %v1594_v26  ;;  %vm328_vm2 = vmand %vm325_vm13, %vm322_vm12  ;;  %vm335_vm12 = vcmp.gt.s32.totalorder %v332_v2, 0  ;;  %vm338_vm13 = vcmp.lt.s32.totalorder %v332_v2, 5 }
  0xa9   : > { %1493 = vmatprep.subr.bf16.mxu0 %v1584_v8  ;;  %v334_v62 = vsel %vm328_vm2, %v331_v59, %v317_v56  ;;  %1511 = vmatprep.subr.bf16.mxu1 %v1596_v35 }
  0xaa   : > { %vm337_vm8 = vcmp.gt.s32.totalorder %v334_v62, 0  ;;  %vm340_vm7 = vcmp.lt.s32.totalorder %v334_v62, 5 }
  0xac   : > { %1494 = vmatpush3.bf16.msra.mxu0 %v1584_v8  ;;  %1512 = vmatpush3.bf16.msra.mxu1 %v1596_v35 }
  0xad   : > { %1495 = vmatprep.subr.bf16.mxu0 %v1585_v10 }
  0xb0   : > { %1496 = vmatpush3.bf16.msra.mxu0 %v1585_v10 }
  0xb1   : > { %1497 = vmatprep.subr.bf16.mxu0 %v1586_v13 }
  0xb4   : > { %1498 = vmatpush3.bf16.msra.mxu0 %v1586_v13 }
  0xb5   : > { %1519 = vmatprep.subr.bf16.mxu0 %v1587_v17 }
  0xb7   : > { %1500 = vmatmul.mubr.msk.bf16.vlgmr.msra.gmra.mrb[4].mxu0 %vm1959_vm9, %v670_v16  ;;  %vm327_vm9 = vmand %vm324_vm11, %vm321_vm3  ;;  %v1204_v16 = vld [vmem:[%s1954_s5] sm:$0x3] }
  0xb8   : > { %1520 = vmatpush3.bf16.msra.mxu0 %v1587_v17  ;;  %v333_v9 = vsel %vm327_vm9, %v330_v61, %v306_v58  ;;  %vm1838_vm11 = vmand %vm337_vm8, %vm340_vm7 }
  0xb9   : > { %1521 = vmatprep.subr.bf16.mxu0 %v1589_v19  ;;  %vm336_vm15 = vcmp.gt.s32.totalorder %v333_v9, 0  ;;  %vm339_vm10 = vcmp.lt.s32.totalorder %v333_v9, 5  ;;  %vm1842_vm3 = vmand %vm335_vm12, %vm338_vm13  ;;  %vm1978_vm12 = vcmask 1044480  }
  0xba   : > { %vm1848_vm7 = vmand %vm336_vm15, %vm339_vm10 }
  0xbc   : > { %1522 = vmatpush3.bf16.msra.mxu0 %v1589_v19 }
  0xbd   : > { %1523 = vmatprep.subr.bf16.mxu0 %v1591_v22 }
  0xc0   : > { %1524 = vmatpush3.bf16.msra.mxu0 %v1591_v22 }
  0xc1   : > { %1525 = vmatprep.subr.bf16.mxu0 %v1593_v24 }
  0xc4   : > { %1526 = vmatpush3.bf16.msra.mxu0 %v1593_v24 }
  0xc5   : > { %1527 = vmatprep.subr.bf16.mxu0 %v1595_v27 }
  0xc8   : > { %1528 = vmatpush3.bf16.msra.mxu0 %v1595_v27 }
 0x16e   : > { %v1485_v31 = vpop.f32.mrb[0].mxu1 }
 0x16f   : > { %v609_v33 = vpop.f32.mrb[1].mxu1 }
 0x170   : > { %v1486_v36 = vpop.f32.mrb[2].mxu1 }
 0x171   : > { %v612_v37 = vpop.f32.mrb[3].mxu1 }
 0x172   : > { %v1469_v40 = vpop.f32.mrb[0].mxu0 }
 0x173   : > { %v618_v43 = vadd.f32 %v1485_v31, %v1469_v40  ;;  %v521_v45 = vpop.f32.mrb[1].mxu0  ;;  %v1597_v40 = vld [vmem:[%s1952_s3 + $0x28] sm:$0xff]  }
 0x174   : > { %v610_v46 = vadd.f32 %v609_v33, %v521_v45  ;;  %v1470_v47 = vpop.f32.mrb[2].mxu0  ;;  %1529 = vmatprep.subr.bf16.mxu0 %v1597_v40 }
 0x175   : > { %v524_v48 = vpop.f32.mrb[3].mxu0  ;;  %1530 = vmatpush3.bf16.msra.mxu0 %v1597_v40 }
 0x176   : > { %v613_v49 = vadd.f32 %v612_v37, %v524_v48 }
 0x18a   : > { %v1501_v0 = vpop.f32.mrb[4].mxu0 }
 0x18b   : > { %v763_v1 = vadd.f32 %v1501_v0, %v618_v43  ;;  %v747_v3 = vpop.f32.mrb[5].mxu0  ;;  %v1598_v43 = vld [vmem:[%s1952_s3 + $0x58] sm:$0xff]  }
 0x18c   : > { %v761_v4 = vadd.f32 %v747_v3, %v610_v46  ;;  %v1502_v8 = vpop.f32.mrb[6].mxu0  ;;  %1513 = vmatprep.subr.bf16.mxu1 %v1598_v43 }
 0x18d   : > { %v772_v10 = vadd.f32 %v1354_v63, %v763_v1  ;;  %v750_v11 = vpop.f32.mrb[7].mxu0  ;;  %1514 = vmatpush3.bf16.msra.mxu1 %v1598_v43 }
 0x18e   : > { %v770_v12 = vadd.f32 %v1354_v63, %v761_v4  ;;  %v762_v13 = vadd.f32 %v750_v11, %v613_v49  ;;  %1535 = vmatprep.subr.bf16.mxu1 %v1599_v51 }
 0x18f   : > { %vm775_vm14 = vcmp.gt.f32.partialorder %v772_v10, 0.0  ;;  %v778_v17 = vmul.f32 0.1, %v772_v10 }
 0x190   : > { %vm773_vm2 = vcmp.gt.f32.partialorder %v770_v12, 0.0  ;;  %v776_v18 = vmul.f32 0.1, %v770_v12  ;;  %v771_v19 = vadd.f32 %v1354_v63, %v762_v13 }
 0x191   : > { %v781_v20 = vsel %vm775_vm14, %v772_v10, %v778_v17  ;;  %v1600_v17 = vld [vmem:[%s1952_s3 + $0x68] sm:$0xff]  }
 0x192   : > { %v790_v23 = vsel %vm1838_vm11, %v781_v20, 0.0  ;;  %v779_v24 = vsel %vm773_vm2, %v770_v12, %v776_v18  ;;  %vm774_vm8 = vcmp.gt.f32.partialorder %v771_v19, 0.0  ;;  %v777_v27 = vmul.f32 0.1, %v771_v19 }
 0x193   : > { %v792_v28 = vpack.c.bf16 %v790_v23, %v790_v23  ;;  %v788_v32 = vsel %vm1842_vm3, %v779_v24, 0.0  ;;  %v1601_v24 = vld [vmem:[%s1952_s3 + $0x70] sm:$0xff]   ;;  %vm1983_vm2 = vcmask 1041408  }
 0x194   : > { %v780_v29 = vsel %vm774_vm8, %v771_v19, %v777_v27 }
 0x195   : > { %v803_v30 = vshrl.u32 %v792_v28, 16  ;;  %v806_v31 = vshll.u32 %v792_v28, 16  ;;  %v789_v33 = vsel %vm1848_vm7, %v780_v29, 0.0  ;;  %v1602_v28 = vld [vmem:[%s1952_s3 + $0x78] sm:$0xff]   ;;  %v1603_v29 = vld [vmem:[%s1952_s3 + $0x80] sm:$0xff]  }
 0x196   : > { %v791_v34 = vpack.c.bf16 %v789_v33, %v788_v32 }
 0x197   : > { %v805_v36 = vrot.slane %v803_v30, 4  ;;  %v808_v37 = vrot.slane %v806_v31, 5  ;;  %v1604_v30 = vld [vmem:[%s1952_s3 + $0x88] sm:$0xff]  }
 0x198   : > { %v795_v38 = vshrl.u32 %v791_v34, 16  ;;  %v798_v39 = vshll.u32 %v791_v34, 16 }
 0x199   : > { %v809_v45 = vor.u32 %v808_v37, %v805_v36 }
 0x19a   : > { %v797_v41 = vrot.slane %v795_v38, 4  ;;  %v800_v42 = vrot.slane %v798_v39, 5 }
 0x19c   : > { %v801_v46 = vor.u32 %v800_v42, %v797_v41 }
 0x19e   : > { %v810_v47 = vsel %vm347_vm0, %v801_v46, %v809_v45  ;;  %v813_v48 = vsel %vm1712_vm4, 0, %v801_v46  ;;  %vm1972_vm0 = vcmask 261120  }
 0x19f   : > { %v814_v49 = vsel %vm1720_vm5, %v810_v47, 0  ;;  %v818_v50 = vshll.u32 %v813_v48, 16  ;;  %v816_v53 = vshrl.u32 %v813_v48, 16  ;;  %v836_v60 = vrot.slane %v813_v48, 1  ;;  %vm1973_vm4 = vmmov %vm1972_vm0 }
 0x1a0   : > { %v823_v52 = vshll.u32 %v814_v49, 16  ;;  %v827_v56 = vshrl.u32 %v814_v49, 16  ;;  %v837_v59 = vrot.slane %v814_v49, 1  ;;  %vm1974_vm5 = vcmask 523264   ;;  %vm1979_vm13 = vmmov %vm1972_vm0 }
 0x1a1   : > { %v820_v54 = vrot.slane %v818_v50, 1  ;;  %vm1975_vm9 = vmmov %vm1974_vm5 }
 0x1a2   : > { %v825_v55 = vrot.slane %v823_v52, 1  ;;  %v838_v25 = vsel %vm395_vm6, %v836_v60, %v837_v59  ;;  %v1062_v61 = vsel %vm395_vm6, %v837_v59, %v1741_v44  ;;  %vm1976_vm6 = vcmask 785408   ;;  %vm1981_vm15 = vmmov %vm1974_vm5 }
 0x1a3   : > { %v821_v57 = vor.u32 %v820_v54, %v816_v53 }
 0x1a4   : > { %v829_v58 = vor.u32 %v827_v56, %v825_v55 }
 0x1a5   : > { %v826_v21 = vsel %vm371_vm1, %v821_v57, %v825_v55 }
 0x1a6   : > { %832 = vrot.lane.b32.xlu1 %v829_v58, %s1619_s14  ;;  %830 = vrot.lane.b32.xlu0 %v826_v21, %s1619_s14  ;;  %v1059_v62 = vsel %vm371_vm1, %v829_v58, %v1741_v44  ;;  %vm1977_vm1 = vmmov %vm1976_vm6 }
 0x1a7   : > { %vm1980_vm14 = vmmov %vm1977_vm1 }
 0x1a8   : > { %vm1982_vm10 = vmmov %vm1977_vm1 }
 0x1a9   : > { %vm1984_vm8 = vmmov %vm1977_vm1 }
 0x1aa   : > { %841 = vrot.lane.b32.xlu1 %v837_v59, %s1617_s11  ;;  %839 = vrot.lane.b32.xlu0 %v838_v25, %s1617_s11 }
 0x1ae   : > { %1063 = vrot.lane.b32.xlu1 %v1062_v61, %s1617_s11  ;;  %1060 = vrot.lane.b32.xlu0 %v1059_v62, %s1619_s14 }
 0x218   : > { %v833_v63 = vpop.permute.xlu1 %832  ;;  %v831_v0 = vpop.permute.xlu0 %830 }
 0x219   : > { %v846_v1 = vsel %vm1972_vm0, %v814_v49, %v833_v63  ;;  %v844_v2 = vsel %vm1973_vm4, %v813_v48, %v831_v0  ;;  %vm1985_vm0 = vmmov %vm1983_vm2 }
 0x21a   : > { %vm1986_vm4 = vmmov %vm1977_vm1 }
 0x21c   : > { %v842_v3 = vpop.permute.xlu1 %841  ;;  %v840_v4 = vpop.permute.xlu0 %839 }
 0x21d   : > { %v850_v8 = vsel %vm1974_vm5, %v846_v1, %v842_v3  ;;  %v848_v9 = vsel %vm1975_vm9, %v844_v2, %v840_v4  ;;  %vm1987_vm5 = vmmov %vm1979_vm13  ;;  %v1211_v2 = vld [vmem:[%s1955_s6] sm:$0x3] }
 0x21e   : > { %v879_v10 = vrot.slane %v850_v8, 3  ;;  %v878_v11 = vrot.slane %v848_v9, 3  ;;  %1531 = vmatprep.mubr.msk.bf16.mxu0 %vm1976_vm6, %v848_v9  ;;  %v1083_v20 = vrot.slane %v848_v9, 6  ;;  %vm1988_vm9 = vmmov %vm1987_vm5 }
 0x21f   : > { %1532 = vmatmul.mubr.msk.bf16.vlgmr.msra.gmra.mrb[8].mxu0 %vm1977_vm1, %v850_v8  ;;  %vm1989_vm6 = vmmov %vm1987_vm5 }
 0x220   : > { %v1064_v44 = vpop.permute.xlu1 %1063  ;;  %v1061_v12 = vpop.permute.xlu0 %1060  ;;  %v880_v13 = vsel %vm1978_vm12, %v878_v11, %v879_v10  ;;  %vm1990_vm12 = vmmov %vm1987_vm5 }
 0x221   : > { %v1066_v18 = vsel %vm1979_vm13, %v814_v49, %v1061_v12  ;;  %1515 = vmatprep.mubr.msk.bf16.mxu1 %vm1980_vm14, %v880_v13  ;;  %vm1991_vm13 = vmmov %vm1987_vm5 }
 0x222   : > { %v1068_v19 = vsel %vm1981_vm15, %v1066_v18, %v1064_v44  ;;  %1516 = vmatmul.mubr.msk.bf16.vlgmr.msra.gmra.mrb[4].mxu1 %vm1982_vm10, %v879_v10  ;;  %vm1992_vm14 = vmmov %vm1987_vm5 }
 0x223   : > { %v1084_v23 = vrot.slane %v1068_v19, 6  ;;  %1536 = vmatpush3.bf16.msra.mxu1 %v1599_v51 }
 0x224   : > { %1537 = vmatprep.subr.bf16.mxu1 %v1600_v17 }
 0x225   : > { %v1085_v27 = vsel %vm1983_vm2, %v1083_v20, %v1084_v23  ;;  %v1086_v31 = vsel %vm1985_vm0, %v1084_v23, %v669_v15 }
 0x226   : > { %1547 = vmatprep.mubr.msk.bf16.mxu1 %vm1984_vm8, %v1085_v27 }
 0x227   : > { %1538 = vmatpush3.bf16.msra.mxu1 %v1600_v17 }
 0x228   : > { %1539 = vmatprep.subr.bf16.mxu1 %v1601_v24 }
 0x22b   : > { %1540 = vmatpush3.bf16.msra.mxu1 %v1601_v24 }
 0x22c   : > { %1541 = vmatprep.subr.bf16.mxu1 %v1602_v28 }
 0x22f   : > { %1542 = vmatpush3.bf16.msra.mxu1 %v1602_v28 }
 0x230   : > { %1543 = vmatprep.subr.bf16.mxu1 %v1603_v29 }
 0x233   : > { %1544 = vmatpush3.bf16.msra.mxu1 %v1603_v29 }
 0x234   : > { %1545 = vmatprep.subr.bf16.mxu1 %v1604_v30 }
 0x237   : > { %1546 = vmatpush3.bf16.msra.mxu1 %v1604_v30 }
 0x23a   : > { %1548 = vmatmul.mubr.msk.bf16.vlgmr.msra.gmra.mrb[8].mxu1 %vm1986_vm4, %v1086_v31 }
 0x2f2   : > { %v1533_v32 = vpop.f32.mrb[8].mxu0 }
 0x2f3   : > { %v1045_v33 = vpop.f32.mrb[9].mxu0 }
 0x2f4   : > { %v1534_v34 = vpop.f32.mrb[10].mxu0 }
 0x2f5   : > { %v1517_v35 = vpop.f32.mrb[4].mxu1  ;;  %v1048_v36 = vpop.f32.mrb[11].mxu0 }
 0x2f6   : > { %v1054_v37 = vadd.f32 %v1533_v32, %v1517_v35  ;;  %v957_v38 = vpop.f32.mrb[5].mxu1 }
 0x2f7   : > { %v1046_v39 = vadd.f32 %v1045_v33, %v957_v38  ;;  %v1518_v40 = vpop.f32.mrb[6].mxu1 }
 0x2f8   : > { %v960_v41 = vpop.f32.mrb[7].mxu1 }
 0x2f9   : > { %v1049_v42 = vadd.f32 %v1048_v36, %v960_v41 }
 0x30d   : > { %v1549_v43 = vpop.f32.mrb[8].mxu1 }
 0x30e   : > { %v1179_v45 = vadd.f32 %v1549_v43, %v1054_v37  ;;  %v1163_v15 = vpop.f32.mrb[9].mxu1 }
 0x30f   : > { %v1177_v46 = vadd.f32 %v1163_v15, %v1046_v39  ;;  %v1550_v47 = vpop.f32.mrb[10].mxu1 }
 0x310   : > { %v1166_v48 = vpop.f32.mrb[11].mxu1  ;;  %v1188_v49 = vadd.f32 %v1403_v14, %v1179_v45 }
 0x311   : > { %v1186_v50 = vadd.f32 %v1403_v14, %v1177_v46  ;;  %v1178_v51 = vadd.f32 %v1166_v48, %v1049_v42 }
 0x312   : > { %v1191_v54 = vsel %vm1838_vm11, %v1188_v49, 0.0  ;;  %vm1206_vm11 = vcmask 254976  }
 0x313   : > { %v1189_v52 = vsel %vm1842_vm3, %v1186_v50, 0.0  ;;  %v1187_v53 = vadd.f32 %v1403_v14, %v1178_v51  ;;  %v1195_v21 = vsel %vm1989_vm6, %v1191_v54, 0.0 }
 0x314   : > { %v1192_v56 = vsel %vm1987_vm5, %v1189_v52, 0.0 }
 0x315   : > { %v1190_v55 = vsel %vm1848_vm7, %v1187_v53, 0.0 }
 0x316   : > { %v1193_v57 = vsel %vm1988_vm9, %v1190_v55, 0.0 }
 0x317   : > { %v1194_v58 = vadd.f32 %v1193_v57, %v1192_v56 }
 0x319   : > { %v1196_v59 = vadd.f32 %v1195_v21, %v1194_v58 }
 0x31b   : > { %v1197_v60 = vrot.slane %v1196_v59, 4 }
 0x31d   : > { %v1198_v25 = vadd.f32 %v1197_v60, %v1196_v59 }
 0x31f   : > { %v1199_v61 = vrot.slane %v1198_v25, 2 }
 0x321   : > { %v1200_v22 = vadd.f32 %v1199_v61, %v1198_v25 }
 0x323   : > { %v1201_v62 = vrot.slane %v1200_v22, 1 }
 0x325   : > { %v1202_v63 = vadd.f32 %v1201_v62, %v1200_v22 }
 0x327   : > { %v1203_v26 = vmul.f32 0.0625, %v1202_v63 }
 0x329   : > { %v1205_v0 = vmul.f32 %v1204_v16, %v1203_v26 }
 0x32b   : > { %v1207_v1 = vsel %vm1206_vm11, %v1205_v0, 0.0 }
 0x32c   : > { %1208 = vadd.xlane.f32.xlu0 %v1207_v1 }
 0x3b9   : > { %v1209_v3 = vpop.xlane.xlu0 %1208 }
 0x3ba   : > { %v1210_v4 = vmax.f32 %v1209_v3, 0.0 }
 0x3bc   : > { %v1212_v8 = vmul.f32 %v1211_v2, %v1210_v4 }
 0x3be   : > { %v1213_v9 = vsel %vm1206_vm11, %v1212_v8, 0.0 }
 0x3bf   : > { %v1214_v10 = vrot.slane %v1213_v9, 4 }
 0x3c1   : > { %v1215_v11 = vadd.f32 %v1214_v10, %v1213_v9 }
 0x3c3   : > { %v1216_v44 = vrot.slane %v1215_v11, 2 }
 0x3c5   : > { %v1217_v12 = vadd.f32 %v1216_v44, %v1215_v11 }
 0x3c7   : > { %v1218_v13 = vrot.slane %v1217_v12, 1 }
 0x3c9   : > { %v1219_v17 = vadd.f32 %v1218_v13, %v1217_v12 }
 0x3cb   : > { %v1404_v18 = vmul.f32 -1.442695, %v1219_v17 }
 0x3cd   : > { %1605 = vpow2.f32 %v1404_v18 }
 0x3d7   : > { %v1606_v19 = vpop.eup %1605 }
 0x3d8   : > { %v1223_v20 = vadd.f32 1.0, %v1606_v19 }
 0x3da   : > { %1607 = vrcp.f32 %v1223_v20 }
 0x3e4   : > { %v1608_v23 = vpop.eup %1607 }
 0x3e5   : > { %v1226_v24 = vmul.f32 %v1608_v23, %v1189_v52  ;;  %v1227_v27 = vmul.f32 %v1608_v23, %v1190_v55  ;;  %v1228_v28 = vmul.f32 %v1608_v23, %v1191_v54 }
 0x3e7   : > { %v1229_v29 = vadd.f32 %v1226_v24, %v1691_v5  ;;  %v1230_v30 = vadd.f32 %v1227_v27, %v1693_v6  ;;  %v1231_v31 = vadd.f32 %v1228_v28, %v1695_v7 }
 0x3e9   : > { %vm1232_vm3 = vcmp.gt.f32.partialorder %v1229_v29, 0.0  ;;  %vm1233_vm7 = vcmp.gt.f32.partialorder %v1230_v30, 0.0  ;;  %vm1234_vm1 = vcmp.gt.f32.partialorder %v1231_v31, 0.0  ;;  %v1235_v32 = vmul.f32 0.1, %v1229_v29 }
 0x3ea   : > { %v1236_v33 = vmul.f32 0.1, %v1230_v30  ;;  %v1237_v34 = vmul.f32 0.1, %v1231_v31 }
 0x3eb   : > { %v1238_v35 = vsel %vm1232_vm3, %v1229_v29, %v1235_v32 }
 0x3ec   : > { %v1239_v36 = vsel %vm1233_vm7, %v1230_v30, %v1236_v33  ;;  %v1240_v37 = vsel %vm1234_vm1, %v1231_v31, %v1237_v34  ;;  %1241 = vst.msk [vmem:[%s278_s15] sm:$0xff] %vm1990_vm12, %v1238_v35 }
 0x3ed   : > { %1242 = vst.msk [vmem:[%s278_s15 + $0x8] sm:$0xff] %vm1991_vm13, %v1239_v36 }
 0x3ee   : > { %1243 = vst.msk [vmem:[%s278_s15 + $0x10] sm:$0xff] %vm1992_vm14, %v1240_v37 }
 0x3ef PF: > { %s17_s24 = sadd.s32 1, %s1615_s24  }
 0x3f0   : > { %p14_p4 = scmp.ge.s32.totalorder %s17_s24, 4  }
 0x3f2   :  { %16 = sbr.rel (!%p14_p4) target bundleno = 1 (0x1), region = 82 }

</bundles_post_ra>
